<compile_context>
chip_gen: v7x
topology: tpu7x:2x2x1
jax: 0.10.0
libtpu: 0.0.40
codegen_flags: <defaults>
</compile_context>

<pallas_src>
import functools

import jax
import jax.numpy as jnp
from jax.experimental import pallas as pl
from jax.experimental.pallas import tpu as pltpu


def _round_up(x, m):
    return (x + m - 1) // m * m


# ----------------------------------------------------------------------------
# Pallas kernel.  Grid = (batch, phase, spatial tile).
# Layout: channels on sublanes, spatial positions on lanes (lane-dense stores).
# ----------------------------------------------------------------------------
def _basic_block_kernel(C, Cin_eff, size_k, tm, inv_pool,
                        x_ref, mask_ref, wc_ref, w2_ref, b1_ref, bd_ref,
                        b2f_ref, fc1w_ref, fc1b_ref, fc2w_ref, fc2b_ref,
                        out_ref, acc_ref, se_ref, y2c_ref, resc_ref):
    ph = pl.program_id(1)
    t = pl.program_id(2)

    # Defensive init of the parked output window.  During phase 0 the output
    # block index stays on tile 0 and is only written (and then flushed) by
    # phase 1, so this write never reaches HBM in the normal flow -- it only
    # guards against future grid / out-index_map reordering flushing an
    # uninitialized VMEM buffer.
    @pl.when(jnp.logical_and(ph == 0, t == 0))
    def _():
        out_ref[...] = jnp.zeros_like(out_ref)

    @pl.when(ph == 0)
    def _():
        win = x_ref[0, 0]                            # (Cin_eff, tm + size_k - 1) bf16

        # Fused conv1 + downsample conv as one (2C, K) x (K, tm) contraction,
        # with the K = size*Cin taps formed in-kernel from static shifted
        # slices of the haloed window (no size-fold duplication in HBM).
        y = None
        for i in range(size_k):
            w_i = wc_ref[:, i * Cin_eff:(i + 1) * Cin_eff]        # (2C, Cin_eff) bf16
            x_i = win[:, i:i + tm] if size_k > 1 else win         # (Cin_eff, tm) bf16
            d = jnp.dot(w_i, x_i, preferred_element_type=jnp.float32)
            y = d if y is None else y + d                         # (2C, tm) f32

        y1 = jnp.maximum(y[:C] + b1_ref[...], 0.0)                # bn1 + relu
        # dropout(p=0.2) is identity at inference; bn2 folded into w2 / b2f.
        y2 = jnp.dot(w2_ref[...], y1.astype(jnp.bfloat16),
                     preferred_element_type=jnp.float32) + b2f_ref[...]

        # Cache original_out and the downsample residual for phase 1 (kills
        # the v2 phase-1 re-stream + recompute).
        y2c_ref[t] = y2
        resc_ref[t] = y[C:] + bd_ref[...]

        # Online global average pool (mask out padded / out-of-row columns).
        @pl.when(t == 0)
        def _():
            acc_ref[...] = jnp.zeros_like(acc_ref)

        acc_ref[...] += jnp.sum(y2 * mask_ref[...], axis=1, keepdims=True)

        # Squeeze-excite FCs once per batch image, on the last phase-0 tile.
        # hidden = round(C/16) is tiny -> VPU broadcast-multiply-reduce.
        @pl.when(t == pl.num_programs(2) - 1)
        def _():
            pool = acc_ref[...] * inv_pool                        # (C, 1)
            h = jnp.maximum(
                jnp.sum(fc1w_ref[...] * pool, axis=0, keepdims=True)
                + fc1b_ref[...], 0.0)                             # (1, hidden)
            se_ref[...] = jax.nn.sigmoid(
                jnp.sum(fc2w_ref[...] * h, axis=1, keepdims=True)
                + fc2b_ref[...])                                  # (C, 1)

    @pl.when(ph == 1)
    def _():
        # gate * original_out + residual, ReLU; read purely from the VMEM
        # cache (no input DMAs, no matmuls), lane-dense (C, tm) store.
        out_ref[0] = jnp.maximum(
            y2c_ref[t] * se_ref[...] + resc_ref[t], 0.0).astype(out_ref.dtype)


# ----------------------------------------------------------------------------
# Helpers: im2col fallback (stride > 1) and inference-mode BN folding.
# ----------------------------------------------------------------------------
def _im2col(x, size, stride):
    """x: (B, Cin, H, W) NCHW -> patches (B, Cin*size, H_out*W_out)."""
    B, Cin, H, W = x.shape
    H_out = (H - 1) // stride + 1
    W_out = (W - size) // stride + 1
    h_idx = jnp.arange(H_out) * stride
    w_idx = jnp.arange(W_out)[:, None] * stride + jnp.arange(size)[None, :]
    p = x[:, :, h_idx, :]                        # (B, Cin, H_out, W)
    p = p[:, :, :, w_idx]                        # (B, Cin, H_out, W_out, size)
    p = jnp.transpose(p, (0, 1, 4, 2, 3))        # (B, Cin, size, H_out, W_out)
    return p.reshape(B, Cin * size, H_out * W_out), H_out, W_out


def _fold_bn(gamma, beta, mean, var, eps=1e-5):
    scale = gamma / jnp.sqrt(var + eps)
    bias = beta - mean * scale
    return scale, bias


# ----------------------------------------------------------------------------
# Wrapper: layout prep, BN folding, pallas_call.
# ----------------------------------------------------------------------------
def basic_block_2d_forward(x, params, *, size, stride, tm=512,
                           out_dtype=jnp.bfloat16):
    """Pallas TPU forward for BasicBlock2d (inference).  x: (B,Cin,H,W) f32."""
    B, Cin, H, W = x.shape
    planes = params["conv1_w"].shape[0]
    hidden = params["fc1_w"].shape[0]

    H_out = (H - 1) // stride + 1
    W_out = (W - size) // stride + 1
    n_valid = H_out * W_out

    # Fold the inference-mode BatchNorms into weights / per-channel biases.
    s1, b1 = _fold_bn(*params["bn1"])
    s2, b2 = _fold_bn(*params["bn2"])
    sd, bd = _fold_bn(*params["bnd"])

    if stride == 1:
        # Stream the raw rows; the `size` taps are formed in-kernel from a
        # (Cin, tm + size - 1) haloed window.  Each row is laid out with its
        # full width W (the last size-1 columns of each row are garbage and
        # sliced off below, and masked out of the pool).
        size_k, Cin_eff = size, Cin
        W_row = W
        xf = x.reshape(B, Cin, H * W)                       # H_out == H
        # Tap-major weight columns: col = tap * Cin + cin.
        w1 = jnp.transpose(params["conv1_w"][:, :, 0, :], (0, 2, 1)
                           ).reshape(planes, size * Cin)
        wdn = jnp.transpose(params["down_w"][:, :, 0, :], (0, 2, 1)
                            ).reshape(planes, size * Cin)
    else:
        # TODO(synk): form strided taps in-kernel for stride > 1 as well; the
        # im2col fallback duplicates input only by size/stride here.
        size_k, Cin_eff = 1, Cin * size
        W_row = W_out
        xf, _, _ = _im2col(x, size, stride)                 # (B, Cin*size, HW)
        w1 = params["conv1_w"].reshape(planes, Cin * size)
        wdn = params["down_w"].reshape(planes, Cin * size)

    halo = size_k - 1
    L_total = H_out * W_row

    # Spatial tile (lane dim of loads / stores / the VMEM cache): mult of 128.
    tm = max(128, min(_round_up(tm, 128), _round_up(L_total, 128)))
    n_t = (L_total + tm - 1) // tm
    Lp = n_t * tm
    tm_in = tm + halo

    # Build per-tile haloed windows (B, n_t, Cin_eff, tm_in) in bf16: ~1x the
    # input bytes (halo overlap is only (size-1)/tm per tile).
    pad_to = Lp + (tm if halo else 0)
    xf = jnp.pad(xf.astype(jnp.bfloat16),
                 ((0, 0), (0, 0), (0, pad_to - L_total)))
    main = xf[:, :, :Lp].reshape(B, Cin_eff, n_t, tm)
    if halo:
        nxt = xf[:, :, tm:Lp + tm].reshape(B, Cin_eff, n_t, tm)[:, :, :, :halo]
        x_win = jnp.concatenate([main, nxt], axis=3)
    else:
        x_win = main
    x_win = jnp.transpose(x_win, (0, 2, 1, 3))              # (B, n_t, Cin_eff, tm_in)

    # Pool-validity mask over the Lp padded flat positions (tail padding and,
    # for the stride==1 layout, the per-row garbage columns).
    cols = jnp.arange(Lp)
    valid = cols < L_total
    if W_row != W_out:
        valid = valid & ((cols % W_row) < W_out)
    pool_mask = valid.astype(jnp.float32).reshape(1, Lp)

    # Fused conv1 + downsample weights with BN scales folded, bf16 for the MXU.
    wc = jnp.concatenate([w1 * s1[:, None], wdn * sd[:, None]],
                         axis=0).astype(jnp.bfloat16)       # (2C, size_k*Cin_eff)

    w2_raw = params["conv2_w"].reshape(planes, planes)      # (out, in)
    w2 = (w2_raw * s2[None, :]).astype(jnp.bfloat16)        # bn2 scale folded
    b2f = (w2_raw @ b2).reshape(planes, 1)                  # bn2 bias through conv2
    b1c = b1.reshape(planes, 1)
    bdc = bd.reshape(planes, 1)

    fc1w = params["fc1_w"].T                                # (C, hidden)
    fc1b = params["fc1_b"].reshape(1, hidden)
    fc2w = params["fc2_w"]                                  # (C, hidden)
    fc2b = params["fc2_b"].reshape(planes, 1)

    rep = lambda b, ph, t: (0, 0)
    # Park the input / mask windows on the last tile during phase 1 -> phase 1
    # issues zero input DMAs.
    park = lambda b, ph, t: (b, t * (1 - ph) + (n_t - 1) * ph, 0, 0)
    park_m = lambda b, ph, t: (0, t * (1 - ph) + (n_t - 1) * ph)

    grid_spec = pltpu.PrefetchScalarGridSpec(
        num_scalar_prefetch=0,
        grid=(B, 2, n_t),             # batch, phase (pool / apply), spatial tile
        in_specs=[
            pl.BlockSpec((1, 1, Cin_eff, tm_in), park),
            pl.BlockSpec((1, tm), park_m),
            pl.BlockSpec((2 * planes, size_k * Cin_eff), rep),
            pl.BlockSpec((planes, planes), rep),
            pl.BlockSpec((planes, 1), rep),
            pl.BlockSpec((planes, 1), rep),
            pl.BlockSpec((planes, 1), rep),
            pl.BlockSpec((planes, hidden), rep),
            pl.BlockSpec((1, hidden), rep),
            pl.BlockSpec((planes, hidden), rep),
            pl.BlockSpec((planes, 1), rep),
        ],
        # Phase 0 parks the output window on tile 0 (never written -> no HBM
        # writeback during phase 0; phase 1 tile 0 maps to the same block and
        # writes it before the block index ever changes).
        out_specs=pl.BlockSpec((1, planes, tm), lambda b, ph, t: (b, 0, t * ph)),
        scratch_shapes=[
            pltpu.VMEM((planes, 1), jnp.float32),            # pool accumulator
            pltpu.VMEM((planes, 1), jnp.float32),            # sigmoid SE gains
            pltpu.VMEM((n_t, planes, tm), jnp.float32),      # original_out cache
            pltpu.VMEM((n_t, planes, tm), jnp.float32),      # residual cache
        ],
    )

    cache_bytes = 2 * n_t * planes * tm * 4
    vmem_limit = int(min(100 * 2 ** 20, 32 * 2 ** 20 + 2 * cache_bytes))

    K_total = Cin * size
    out_bytes = jnp.dtype(out_dtype).itemsize
    cost = pl.CostEstimate(
        flops=int(B * Lp * (4 * planes * K_total + 2 * planes * planes)),
        transcendentals=int(B * (planes + hidden)),
        bytes_accessed=int(x_win.size * 2 + pool_mask.size * 4
                           + wc.size * 2 + w2.size * 2
                           + B * planes * Lp * out_bytes))

    kernel = functools.partial(_basic_block_kernel, planes, Cin_eff, size_k,
                               tm, 1.0 / float(n_valid))
    out = pl.pallas_call(
        kernel,
        out_shape=jax.ShapeDtypeStruct((B, planes, Lp), out_dtype),
        grid_spec=grid_spec,
        compiler_params=pltpu.CompilerParams(
            dimension_semantics=("parallel", "arbitrary", "arbitrary"),
            vmem_limit_bytes=vmem_limit),
        cost_estimate=cost,
    )(x_win, pool_mask, wc, w2, b1c, bdc, b2f, fc1w, fc1b, fc2w, fc2b)

    # (B, C, Lp): drop tail padding, un-flatten rows, drop per-row garbage
    # columns (stride==1 layout) -> NCHW.  No transpose needed anywhere.
    out = out[:, :, :L_total].reshape(B, planes, H_out, W_row)
    return out[:, :, :, :W_out]


# ----------------------------------------------------------------------------
# Pure-JAX f32 reference for verification.
# ----------------------------------------------------------------------------
def _ref_forward(x, params, *, size, stride):
    def conv(y, w, s):
        return jax.lax.conv_general_dilated(
            y, w, window_strides=s, padding="VALID",
            dimension_numbers=("NCHW", "OIHW", "NCHW"))

    def bn(y, p):
        s, b = _fold_bn(*p)
        return y * s[None, :, None, None] + b[None, :, None, None]

    res = bn(conv(x, params["down_w"], (stride, stride)), params["bnd"])
    out = conv(x, params["conv1_w"], (stride, stride))
    out = jnp.maximum(bn(out, params["bn1"]), 0.0)
    out = bn(out, params["bn2"])
    out = conv(out, params["conv2_w"], (1, 1))
    original = out
    pool = out.mean(axis=(2, 3))
    h = jnp.maximum(pool @ params["fc1_w"].T + params["fc1_b"], 0.0)
    se = jax.nn.sigmoid(h @ params["fc2_w"].T + params["fc2_b"])
    out = original * se[:, :, None, None] + res
    return jnp.maximum(out, 0.0)


# ----------------------------------------------------------------------------
# Deterministic synthetic parameters + run.
# ----------------------------------------------------------------------------
def _init_params(key, inplanes, planes, size):
    hidden = round(planes / 16)
    ks = jax.random.split(key, 10)

    def bn_params(k):
        k1, k2, k3, k4 = jax.random.split(k, 4)
        gamma = jax.random.uniform(k1, (planes,), minval=0.5, maxval=1.5)
        beta = jax.random.normal(k2, (planes,)) * 0.1
        mean = jax.random.normal(k3, (planes,)) * 0.1
        var = jax.random.uniform(k4, (planes,), minval=0.5, maxval=1.5)
        return (gamma, beta, mean, var)

    return {
        "conv1_w": jax.random.normal(ks[0], (planes, inplanes, 1, size)) * 0.1,
        "conv2_w": jax.random.normal(ks[1], (planes, planes, 1, 1)) * 0.1,
        "down_w": jax.random.normal(ks[2], (planes, inplanes, 1, size)) * 0.1,
        "bn1": bn_params(ks[3]),
        "bn2": bn_params(ks[4]),
        "bnd": bn_params(ks[5]),
        "fc1_w": jax.random.normal(ks[6], (hidden, planes)) * 0.1,
        "fc1_b": jax.random.normal(ks[7], (hidden,)) * 0.1,
        "fc2_w": jax.random.normal(ks[8], (planes, hidden)) * 0.1,
        "fc2_b": jax.random.normal(ks[9], (planes,)) * 0.1,
    }


def _check(out, ref, tag):
    assert out.shape == ref.shape, (tag, out.shape, ref.shape)
    err = float(jnp.max(jnp.abs(out.astype(jnp.float32) - ref)))
    scale = float(jnp.max(jnp.abs(ref)))
    # bf16 inputs/weights/output with f32 accumulation -> ~1-2% worst case.
    assert err <= 3e-2 * scale + 1e-3, (tag, err, scale)


if __name__ == "__main__":
    key = jax.random.PRNGKey(0)
    k1, k2, k3, k4 = jax.random.split(key, 4)

    # Test 1: stride=1 path (in-kernel tap formation, 3 spatial tiles of 512,
    # exercises both the per-row and tail pool masks, the VMEM y2/res cache,
    # phase parking, and B=2 for the parallel batch axis).
    B, inplanes, H, W = 2, 8, 4, 300
    planes, size, stride = 32, 3, 1
    x = jax.random.normal(k1, (B, inplanes, H, W), dtype=jnp.float32)
    params = _init_params(k2, inplanes, planes, size)
    fwd = jax.jit(functools.partial(basic_block_2d_forward,
                                    size=size, stride=stride))
    out = jax.block_until_ready(fwd(x, params))
    _check(out, _ref_forward(x, params, size=size, stride=stride), "stride1")

    # Test 2: stride=2 fallback path (im2col windows, single spatial tile).
    B2, in2, H2, W2 = 1, 4, 5, 37
    size2, stride2 = 3, 2
    x2 = jax.random.normal(k3, (B2, in2, H2, W2), dtype=jnp.float32)
    params2 = _init_params(k4, in2, planes, size2)
    fwd2 = jax.jit(functools.partial(basic_block_2d_forward,
                                     size=size2, stride=stride2))
    out2 = jax.block_until_ready(fwd2(x2, params2))
    _check(out2, _ref_forward(x2, params2, size=size2, stride=stride2), "stride2")

    print("KERNEL_OK")
</pallas_src>

<mosaic_0001>
module attributes {stable_mosaic.version = 11 : i64} {
  func.func @_basic_block_kernel(%arg0: i32, %arg1: i32, %arg2: i32, %arg3: memref<1x1x8x514xbf16, #tpu.memory_space<vmem>>, %arg4: memref<1x512xf32, #tpu.memory_space<vmem>>, %arg5: memref<64x24xbf16, #tpu.memory_space<vmem>>, %arg6: memref<32x32xbf16, #tpu.memory_space<vmem>>, %arg7: memref<32x1xf32, #tpu.memory_space<vmem>>, %arg8: memref<32x1xf32, #tpu.memory_space<vmem>>, %arg9: memref<32x1xf32, #tpu.memory_space<vmem>>, %arg10: memref<32x2xf32, #tpu.memory_space<vmem>>, %arg11: memref<1x2xf32, #tpu.memory_space<vmem>>, %arg12: memref<32x2xf32, #tpu.memory_space<vmem>>, %arg13: memref<32x1xf32, #tpu.memory_space<vmem>>, %arg14: memref<1x32x512xbf16, #tpu.memory_space<vmem>>, %arg15: memref<32x1xf32, #tpu.memory_space<vmem>>, %arg16: memref<32x1xf32, #tpu.memory_space<vmem>>, %arg17: memref<3x32x512xf32, #tpu.memory_space<vmem>>, %arg18: memref<3x32x512xf32, #tpu.memory_space<vmem>>) attributes {dimension_semantics = [#tpu.dimension_semantics<parallel>, #tpu.dimension_semantics<arbitrary>, #tpu.dimension_semantics<arbitrary>], iteration_bounds = array<i64: 2, 2, 3>, scalar_prefetch = 0 : i64, scratch_operands = 4 : i64, tpu.core_type = #tpu.core_type<tc>, window_params = [{transform_indices = @transform_0, window_bounds = array<i64: 1, 1, 8, 514>}, {transform_indices = @transform_1, window_bounds = array<i64: 1, 512>}, {pipeline_mode = #tpu.pipeline_mode<synchronous>, transform_indices = @transform_2, window_bounds = array<i64: 64, 24>}, {pipeline_mode = #tpu.pipeline_mode<synchronous>, transform_indices = @transform_3, window_bounds = array<i64: 32, 32>}, {pipeline_mode = #tpu.pipeline_mode<synchronous>, transform_indices = @transform_4, window_bounds = array<i64: 32, 1>}, {pipeline_mode = #tpu.pipeline_mode<synchronous>, transform_indices = @transform_5, window_bounds = array<i64: 32, 1>}, {pipeline_mode = #tpu.pipeline_mode<synchronous>, transform_indices = @transform_6, window_bounds = array<i64: 32, 1>}, {pipeline_mode = #tpu.pipeline_mode<synchronous>, transform_indices = @transform_7, window_bounds = array<i64: 32, 2>}, {pipeline_mode = #tpu.pipeline_mode<synchronous>, transform_indices = @transform_8, window_bounds = array<i64: 1, 2>}, {pipeline_mode = #tpu.pipeline_mode<synchronous>, transform_indices = @transform_9, window_bounds = array<i64: 32, 2>}, {pipeline_mode = #tpu.pipeline_mode<synchronous>, transform_indices = @transform_10, window_bounds = array<i64: 32, 1>}, {transform_indices = @transform_11, window_bounds = array<i64: 1, 32, 512>}]} {
    %c0_i32 = arith.constant 0 : i32
    %0 = arith.cmpi eq, %arg1, %c0_i32 : i32
    %c0_i32_0 = arith.constant 0 : i32
    %1 = arith.cmpi eq, %arg2, %c0_i32_0 : i32
    %2 = arith.andi %0, %1 : i1
    %3 = arith.extui %2 : i1 to i32
    %c0_i32_1 = arith.constant 0 : i32
    %4 = arith.cmpi ne, %3, %c0_i32_1 : i32
    scf.if %4 {
      %cst = arith.constant 0.000000e+00 : bf16
      %11 = vector.broadcast %cst : bf16 to vector<1x32x512xbf16>
      %c0 = arith.constant 0 : index
      %c0_5 = arith.constant 0 : index
      %c0_6 = arith.constant 0 : index
      %12 = vector.load %arg14[%c0, %c0_5, %c0_6] : memref<1x32x512xbf16, #tpu.memory_space<vmem>>, vector<1x32x512xbf16>
      tpu.vector_store %arg14[%c0, %c0_5, %c0_6], %11 {strides = array<i32>} : memref<1x32x512xbf16, #tpu.memory_space<vmem>>, vector<1x32x512xbf16>,
    } else {
    }
    %c0_i32_2 = arith.constant 0 : i32
    %5 = arith.cmpi eq, %arg1, %c0_i32_2 : i32
    %6 = arith.extui %5 : i1 to i32
    %c0_i32_3 = arith.constant 0 : i32
    %7 = arith.cmpi ne, %6, %c0_i32_3 : i32
    scf.if %7 {
      %c0 = arith.constant 0 : index
      %c0_5 = arith.constant 0 : index
      %c0_6 = arith.constant 0 : index
      %c0_7 = arith.constant 0 : index
      %11 = vector.load %arg3[%c0, %c0_5, %c0_6, %c0_7] : memref<1x1x8x514xbf16, #tpu.memory_space<vmem>>, vector<1x1x8x514xbf16>
      %12 = vector.shape_cast %11 : vector<1x1x8x514xbf16> to vector<8x514xbf16>
      %c0_8 = arith.constant 0 : index
      %c0_9 = arith.constant 0 : index
      %13 = vector.load %arg5[%c0_8, %c0_9] : memref<64x24xbf16, #tpu.memory_space<vmem>>, vector<64x8xbf16>
      %14 = vector.extract_strided_slice %12 {offsets = [0, 0], sizes = [8, 512], strides = [1, 1]} : vector<8x514xbf16> to vector<8x512xbf16>
      %cst = arith.constant dense<0.000000e+00> : vector<64x512xf32>
      %15 = tpu.matmul %13, %14, %cst {dimension_numbers = #tpu.dot_dimension_numbers<[1], [0], [0], [1], [0, 0, 1, 1], [], []>} : vector<64x8xbf16>, vector<8x512xbf16>, vector<64x512xf32> -> vector<64x512xf32>
      %c0_10 = arith.constant 0 : index
      %c8 = arith.constant 8 : index
      %16 = vector.load %arg5[%c0_10, %c8] : memref<64x24xbf16, #tpu.memory_space<vmem>>, vector<64x8xbf16>
      %17 = vector.extract_strided_slice %12 {offsets = [0, 1], sizes = [8, 512], strides = [1, 1]} : vector<8x514xbf16> to vector<8x512xbf16>
      %cst_11 = arith.constant dense<0.000000e+00> : vector<64x512xf32>
      %18 = tpu.matmul %16, %17, %cst_11 {dimension_numbers = #tpu.dot_dimension_numbers<[1], [0], [0], [1], [0, 0, 1, 1], [], []>} : vector<64x8xbf16>, vector<8x512xbf16>, vector<64x512xf32> -> vector<64x512xf32>
      %19 = arith.addf %15, %18 : vector<64x512xf32>
      %c0_12 = arith.constant 0 : index
      %c16 = arith.constant 16 : index
      %20 = vector.load %arg5[%c0_12, %c16] : memref<64x24xbf16, #tpu.memory_space<vmem>>, vector<64x8xbf16>
      %21 = vector.extract_strided_slice %12 {offsets = [0, 2], sizes = [8, 512], strides = [1, 1]} : vector<8x514xbf16> to vector<8x512xbf16>
      %cst_13 = arith.constant dense<0.000000e+00> : vector<64x512xf32>
      %22 = tpu.matmul %20, %21, %cst_13 {dimension_numbers = #tpu.dot_dimension_numbers<[1], [0], [0], [1], [0, 0, 1, 1], [], []>} : vector<64x8xbf16>, vector<8x512xbf16>, vector<64x512xf32> -> vector<64x512xf32>
      %23 = arith.addf %19, %22 : vector<64x512xf32>
      %24 = vector.extract_strided_slice %23 {offsets = [0, 0], sizes = [32, 512], strides = [1, 1]} : vector<64x512xf32> to vector<32x512xf32>
      %c0_14 = arith.constant 0 : index
      %c0_15 = arith.constant 0 : index
      %25 = vector.load %arg7[%c0_14, %c0_15] : memref<32x1xf32, #tpu.memory_space<vmem>>, vector<32x1xf32>
      %26 = vector.broadcast %25 : vector<32x1xf32> to vector<32x512xf32>
      %27 = arith.addf %24, %26 : vector<32x512xf32>
      %cst_16 = arith.constant 0.000000e+00 : f32
      %28 = vector.broadcast %cst_16 : f32 to vector<32x512xf32>
      %29 = arith.maximumf %27, %28 : vector<32x512xf32>
      %c0_17 = arith.constant 0 : index
      %c0_18 = arith.constant 0 : index
      %30 = vector.load %arg6[%c0_17, %c0_18] : memref<32x32xbf16, #tpu.memory_space<vmem>>, vector<32x32xbf16>
      %31 = arith.truncf %29 : vector<32x512xf32> to vector<32x512xbf16>
      %cst_19 = arith.constant dense<0.000000e+00> : vector<32x512xf32>
      %32 = tpu.matmul %30, %31, %cst_19 {dimension_numbers = #tpu.dot_dimension_numbers<[1], [0], [0], [1], [0, 0, 1, 1], [], []>} : vector<32x32xbf16>, vector<32x512xbf16>, vector<32x512xf32> -> vector<32x512xf32>
      %c0_20 = arith.constant 0 : index
      %c0_21 = arith.constant 0 : index
      %33 = vector.load %arg9[%c0_20, %c0_21] : memref<32x1xf32, #tpu.memory_space<vmem>>, vector<32x1xf32>
      %34 = vector.broadcast %33 : vector<32x1xf32> to vector<32x512xf32>
      %35 = arith.addf %32, %34 : vector<32x512xf32>
      %36 = arith.index_cast %arg2 : i32 to index
      %c0_22 = arith.constant 0 : index
      %c0_23 = arith.constant 0 : index
      %37 = vector.load %arg17[%36, %c0_22, %c0_23] : memref<3x32x512xf32, #tpu.memory_space<vmem>>, vector<1x32x512xf32>
      %38 = vector.shape_cast %37 : vector<1x32x512xf32> to vector<32x512xf32>
      %39 = vector.shape_cast %35 : vector<32x512xf32> to vector<1x32x512xf32>
      tpu.vector_store %arg17[%36, %c0_22, %c0_23], %39 {strides = array<i32>} : memref<3x32x512xf32, #tpu.memory_space<vmem>>, vector<1x32x512xf32>,
      %40 = vector.extract_strided_slice %23 {offsets = [32, 0], sizes = [32, 512], strides = [1, 1]} : vector<64x512xf32> to vector<32x512xf32>
      %c0_24 = arith.constant 0 : index
      %c0_25 = arith.constant 0 : index
      %41 = vector.load %arg8[%c0_24, %c0_25] : memref<32x1xf32, #tpu.memory_space<vmem>>, vector<32x1xf32>
      %42 = vector.broadcast %41 : vector<32x1xf32> to vector<32x512xf32>
      %43 = arith.addf %40, %42 : vector<32x512xf32>
      %44 = arith.index_cast %arg2 : i32 to index
      %c0_26 = arith.constant 0 : index
      %c0_27 = arith.constant 0 : index
      %45 = vector.load %arg18[%44, %c0_26, %c0_27] : memref<3x32x512xf32, #tpu.memory_space<vmem>>, vector<1x32x512xf32>
      %46 = vector.shape_cast %45 : vector<1x32x512xf32> to vector<32x512xf32>
      %47 = vector.shape_cast %43 : vector<32x512xf32> to vector<1x32x512xf32>
      tpu.vector_store %arg18[%44, %c0_26, %c0_27], %47 {strides = array<i32>} : memref<3x32x512xf32, #tpu.memory_space<vmem>>, vector<1x32x512xf32>,
      %c0_i32_28 = arith.constant 0 : i32
      %48 = arith.cmpi eq, %arg2, %c0_i32_28 : i32
      %49 = arith.extui %48 : i1 to i32
      %c0_i32_29 = arith.constant 0 : i32
      %50 = arith.cmpi ne, %49, %c0_i32_29 : i32
      scf.if %50 {
        %cst_38 = arith.constant 0.000000e+00 : f32
        %62 = vector.broadcast %cst_38 : f32 to vector<32x1xf32>
        %c0_39 = arith.constant 0 : index
        %c0_40 = arith.constant 0 : index
        %63 = vector.load %arg15[%c0_39, %c0_40] : memref<32x1xf32, #tpu.memory_space<vmem>>, vector<32x1xf32>
        tpu.vector_store %arg15[%c0_39, %c0_40], %62 {strides = array<i32>} : memref<32x1xf32, #tpu.memory_space<vmem>>, vector<32x1xf32>,
      } else {
      }
      %c0_30 = arith.constant 0 : index
      %c0_31 = arith.constant 0 : index
      %51 = vector.load %arg15[%c0_30, %c0_31] : memref<32x1xf32, #tpu.memory_space<vmem>>, vector<32x1xf32>
      %c0_32 = arith.constant 0 : index
      %c0_33 = arith.constant 0 : index
      %52 = vector.load %arg4[%c0_32, %c0_33] : memref<1x512xf32, #tpu.memory_space<vmem>>, vector<1x512xf32>
      %53 = vector.broadcast %52 : vector<1x512xf32> to vector<32x512xf32>
      %54 = arith.mulf %35, %53 : vector<32x512xf32>
      %cst_34 = arith.constant dense<0.000000e+00> : vector<32xf32>
      %55 = vector.multi_reduction <add>, %54, %cst_34 [1] : vector<32x512xf32> to vector<32xf32>
      %56 = vector.shape_cast %55 : vector<32xf32> to vector<32x1xf32>
      %57 = arith.addf %51, %56 : vector<32x1xf32>
      %c0_35 = arith.constant 0 : index
      %c0_36 = arith.constant 0 : index
      %58 = vector.load %arg15[%c0_35, %c0_36] : memref<32x1xf32, #tpu.memory_space<vmem>>, vector<32x1xf32>
      tpu.vector_store %arg15[%c0_35, %c0_36], %57 {strides = array<i32>} : memref<32x1xf32, #tpu.memory_space<vmem>>, vector<32x1xf32>,
      %c2_i32 = arith.constant 2 : i32
      %59 = arith.cmpi eq, %arg2, %c2_i32 : i32
      %60 = arith.extui %59 : i1 to i32
      %c0_i32_37 = arith.constant 0 : i32
      %61 = arith.cmpi ne, %60, %c0_i32_37 : i32
      scf.if %61 {
        %c0_38 = arith.constant 0 : index
        %c0_39 = arith.constant 0 : index
        %62 = vector.load %arg15[%c0_38, %c0_39] : memref<32x1xf32, #tpu.memory_space<vmem>>, vector<32x1xf32>
        %cst_40 = arith.constant 8.38926178E-4 : f32
        %63 = vector.broadcast %cst_40 : f32 to vector<32x1xf32>
        %64 = arith.mulf %62, %63 : vector<32x1xf32>
        %c0_41 = arith.constant 0 : index
        %c0_42 = arith.constant 0 : index
        %65 = vector.load %arg10[%c0_41, %c0_42] : memref<32x2xf32, #tpu.memory_space<vmem>>, vector<32x2xf32>
        %66 = vector.broadcast %64 : vector<32x1xf32> to vector<32x2xf32>
        %67 = arith.mulf %65, %66 : vector<32x2xf32>
        %cst_43 = arith.constant dense<0.000000e+00> : vector<2xf32>
        %68 = vector.multi_reduction <add>, %67, %cst_43 [0] : vector<32x2xf32> to vector<2xf32>
        %69 = vector.shape_cast %68 : vector<2xf32> to vector<1x2xf32>
        %c0_44 = arith.constant 0 : index
        %c0_45 = arith.constant 0 : index
        %70 = vector.load %arg11[%c0_44, %c0_45] : memref<1x2xf32, #tpu.memory_space<vmem>>, vector<1x2xf32>
        %71 = arith.addf %69, %70 : vector<1x2xf32>
        %cst_46 = arith.constant 0.000000e+00 : f32
        %72 = vector.broadcast %cst_46 : f32 to vector<1x2xf32>
        %73 = arith.maximumf %71, %72 : vector<1x2xf32>
        %c0_47 = arith.constant 0 : index
        %c0_48 = arith.constant 0 : index
        %74 = vector.load %arg12[%c0_47, %c0_48] : memref<32x2xf32, #tpu.memory_space<vmem>>, vector<32x2xf32>
        %75 = vector.broadcast %73 : vector<1x2xf32> to vector<32x2xf32>
        %76 = arith.mulf %74, %75 : vector<32x2xf32>
        %cst_49 = arith.constant dense<0.000000e+00> : vector<32xf32>
        %77 = vector.multi_reduction <add>, %76, %cst_49 [1] : vector<32x2xf32> to vector<32xf32>
        %78 = vector.shape_cast %77 : vector<32xf32> to vector<32x1xf32>
        %c0_50 = arith.constant 0 : index
        %c0_51 = arith.constant 0 : index
        %79 = vector.load %arg13[%c0_50, %c0_51] : memref<32x1xf32, #tpu.memory_space<vmem>>, vector<32x1xf32>
        %80 = arith.addf %78, %79 : vector<32x1xf32>
        %81 = arith.negf %80 : vector<32x1xf32>
        %82 = math.exp %81 : vector<32x1xf32>
        %cst_52 = arith.constant 1.000000e+00 : f32
        %83 = vector.broadcast %cst_52 : f32 to vector<32x1xf32>
        %84 = arith.addf %83, %82 : vector<32x1xf32>
        %85 = arith.divf %83, %84 : vector<32x1xf32>
        %c0_53 = arith.constant 0 : index
        %c0_54 = arith.constant 0 : index
        %86 = vector.load %arg16[%c0_53, %c0_54] : memref<32x1xf32, #tpu.memory_space<vmem>>, vector<32x1xf32>
        tpu.vector_store %arg16[%c0_53, %c0_54], %85 {strides = array<i32>} : memref<32x1xf32, #tpu.memory_space<vmem>>, vector<32x1xf32>,
      } else {
      }
    } else {
    }
    %c1_i32 = arith.constant 1 : i32
    %8 = arith.cmpi eq, %arg1, %c1_i32 : i32
    %9 = arith.extui %8 : i1 to i32
    %c0_i32_4 = arith.constant 0 : i32
    %10 = arith.cmpi ne, %9, %c0_i32_4 : i32
    scf.if %10 {
      %11 = arith.index_cast %arg2 : i32 to index
      %c0 = arith.constant 0 : index
      %c0_5 = arith.constant 0 : index
      %12 = vector.load %arg17[%11, %c0, %c0_5] : memref<3x32x512xf32, #tpu.memory_space<vmem>>, vector<1x32x512xf32>
      %13 = vector.shape_cast %12 : vector<1x32x512xf32> to vector<32x512xf32>
      %c0_6 = arith.constant 0 : index
      %c0_7 = arith.constant 0 : index
      %14 = vector.load %arg16[%c0_6, %c0_7] : memref<32x1xf32, #tpu.memory_space<vmem>>, vector<32x1xf32>
      %15 = vector.broadcast %14 : vector<32x1xf32> to vector<32x512xf32>
      %16 = arith.mulf %13, %15 : vector<32x512xf32>
      %17 = arith.index_cast %arg2 : i32 to index
      %c0_8 = arith.constant 0 : index
      %c0_9 = arith.constant 0 : index
      %18 = vector.load %arg18[%17, %c0_8, %c0_9] : memref<3x32x512xf32, #tpu.memory_space<vmem>>, vector<1x32x512xf32>
      %19 = vector.shape_cast %18 : vector<1x32x512xf32> to vector<32x512xf32>
      %20 = arith.addf %16, %19 : vector<32x512xf32>
      %cst = arith.constant 0.000000e+00 : f32
      %21 = vector.broadcast %cst : f32 to vector<32x512xf32>
      %22 = arith.maximumf %20, %21 : vector<32x512xf32>
      %23 = arith.truncf %22 : vector<32x512xf32> to vector<32x512xbf16>
      %c0_10 = arith.constant 0 : index
      %c0_11 = arith.constant 0 : index
      %c0_12 = arith.constant 0 : index
      %24 = vector.load %arg14[%c0_10, %c0_11, %c0_12] : memref<1x32x512xbf16, #tpu.memory_space<vmem>>, vector<1x32x512xbf16>
      %25 = vector.shape_cast %24 : vector<1x32x512xbf16> to vector<32x512xbf16>
      %26 = vector.shape_cast %23 : vector<32x512xbf16> to vector<1x32x512xbf16>
      tpu.vector_store %arg14[%c0_10, %c0_11, %c0_12], %26 {strides = array<i32>} : memref<1x32x512xbf16, #tpu.memory_space<vmem>>, vector<1x32x512xbf16>,
    } else {
    }
    return
  }
  func.func @transform_0(%arg0: i32, %arg1: i32, %arg2: i32) -> (i32, i32, i32, i32) {
    %c1_i32 = arith.constant 1 : i32
    %0 = arith.subi %c1_i32, %arg1 : i32
    %1 = arith.muli %arg2, %0 : i32
    %c2_i32 = arith.constant 2 : i32
    %2 = arith.muli %c2_i32, %arg1 : i32
    %3 = arith.addi %1, %2 : i32
    %c0_i32 = arith.constant 0 : i32
    %c0_i32_0 = arith.constant 0 : i32
    %c0_i32_1 = arith.constant 0 : i32
    return %arg0, %3, %c0_i32, %c0_i32_0 : i32, i32, i32, i32
  }
  func.func @transform_1(%arg0: i32, %arg1: i32, %arg2: i32) -> (i32, i32) {
    %c1_i32 = arith.constant 1 : i32
    %0 = arith.subi %c1_i32, %arg1 : i32
    %1 = arith.muli %arg2, %0 : i32
    %c2_i32 = arith.constant 2 : i32
    %2 = arith.muli %c2_i32, %arg1 : i32
    %3 = arith.addi %1, %2 : i32
    %c0_i32 = arith.constant 0 : i32
    %c0_i32_0 = arith.constant 0 : i32
    return %c0_i32, %3 : i32, i32
  }
  func.func @transform_2(%arg0: i32, %arg1: i32, %arg2: i32) -> (i32, i32) {
    %c0_i32 = arith.constant 0 : i32
    %c0_i32_0 = arith.constant 0 : i32
    %c0_i32_1 = arith.constant 0 : i32
    return %c0_i32, %c0_i32_0 : i32, i32
  }
  func.func @transform_3(%arg0: i32, %arg1: i32, %arg2: i32) -> (i32, i32) {
    %c0_i32 = arith.constant 0 : i32
    %c0_i32_0 = arith.constant 0 : i32
    %c0_i32_1 = arith.constant 0 : i32
    return %c0_i32, %c0_i32_0 : i32, i32
  }
  func.func @transform_4(%arg0: i32, %arg1: i32, %arg2: i32) -> (i32, i32) {
    %c0_i32 = arith.constant 0 : i32
    %c0_i32_0 = arith.constant 0 : i32
    %c0_i32_1 = arith.constant 0 : i32
    return %c0_i32, %c0_i32_0 : i32, i32
  }
  func.func @transform_5(%arg0: i32, %arg1: i32, %arg2: i32) -> (i32, i32) {
    %c0_i32 = arith.constant 0 : i32
    %c0_i32_0 = arith.constant 0 : i32
    %c0_i32_1 = arith.constant 0 : i32
    return %c0_i32, %c0_i32_0 : i32, i32
  }
  func.func @transform_6(%arg0: i32, %arg1: i32, %arg2: i32) -> (i32, i32) {
    %c0_i32 = arith.constant 0 : i32
    %c0_i32_0 = arith.constant 0 : i32
    %c0_i32_1 = arith.constant 0 : i32
    return %c0_i32, %c0_i32_0 : i32, i32
  }
  func.func @transform_7(%arg0: i32, %arg1: i32, %arg2: i32) -> (i32, i32) {
    %c0_i32 = arith.constant 0 : i32
    %c0_i32_0 = arith.constant 0 : i32
    %c0_i32_1 = arith.constant 0 : i32
    return %c0_i32, %c0_i32_0 : i32, i32
  }
  func.func @transform_8(%arg0: i32, %arg1: i32, %arg2: i32) -> (i32, i32) {
    %c0_i32 = arith.constant 0 : i32
    %c0_i32_0 = arith.constant 0 : i32
    %c0_i32_1 = arith.constant 0 : i32
    return %c0_i32, %c0_i32_0 : i32, i32
  }
  func.func @transform_9(%arg0: i32, %arg1: i32, %arg2: i32) -> (i32, i32) {
    %c0_i32 = arith.constant 0 : i32
    %c0_i32_0 = arith.constant 0 : i32
    %c0_i32_1 = arith.constant 0 : i32
    return %c0_i32, %c0_i32_0 : i32, i32
  }
  func.func @transform_10(%arg0: i32, %arg1: i32, %arg2: i32) -> (i32, i32) {
    %c0_i32 = arith.constant 0 : i32
    %c0_i32_0 = arith.constant 0 : i32
    %c0_i32_1 = arith.constant 0 : i32
    return %c0_i32, %c0_i32_0 : i32, i32
  }
  func.func @transform_11(%arg0: i32, %arg1: i32, %arg2: i32) -> (i32, i32, i32) {
    %0 = arith.muli %arg2, %arg1 : i32
    %c0_i32 = arith.constant 0 : i32
    %c0_i32_0 = arith.constant 0 : i32
    return %arg0, %c0_i32, %0 : i32, i32, i32
  }
}

</mosaic_0001>

<bundles_post_ra>
// kernel: basic_block_2d_forward.1
= control target key start
LH: loop header
LB: loop body
LE: loop exit
PB: predicated region body
PF: predicated region fallthrough
CT: control target
= control target key end

     0   :  { %s2365_s17 = smov 0   ;;  %s2367_s18 = smov 0   ;;  %s2906_s0 = inlined_call_operand.vmem [shape: bf16[2,3,8,514], index: 0, kind: input, shape index: {}]   ;;  %s2907_s1 = inlined_call_operand.vmem [shape: f32[1,1536], index: 1, kind: input, shape index: {}]   ;;  %s2908_s2 = inlined_call_operand.vmem [shape: bf16[64,24], index: 2, kind: input, shape index: {}]   ;;  %s2909_s3 = inlined_call_operand.vmem [shape: bf16[32,32], index: 3, kind: input, shape index: {}]   ;;  %s2910_s4 = inlined_call_operand.vmem [shape: f32[32,1], index: 4, kind: input, shape index: {}]   ;;  %s2911_s5 = inlined_call_operand.vmem [shape: f32[32,1], index: 5, kind: input, shape index: {}]   ;;  %s2912_s6 = inlined_call_operand.vmem [shape: f32[32,1], index: 6, kind: input, shape index: {}]   ;;  %s2913_s7 = inlined_call_operand.vmem [shape: f32[32,2], index: 7, kind: input, shape index: {}]   ;;  %s2914_s8 = inlined_call_operand.vmem [shape: f32[1,2], index: 8, kind: input, shape index: {}]   ;;  %s2915_s9 = inlined_call_operand.vmem [shape: f32[32,2], index: 9, kind: input, shape index: {}]   ;;  %s2916_s10 = inlined_call_operand.vmem [shape: f32[32,1], index: 10, kind: input, shape index: {}]   ;;  %s2917_s11 = inlined_call_operand.vmem [shape: bf16[2,32,1536], index: 11, kind: output, shape index: {}]  }
   0x1   :  { %s2369_s19 = smov 0   ;;  %s2371_s20 = smov 0  }
   0x2   :  { %s2373_s21 = smov 0   ;;  %s2375_s22 = smov 0  }
   0x3   :  { %s2377_s23 = smov 0   ;;  %s2379_s24 = smov 0  }
   0x4   :  { %s2381_s25 = smov 0  }
   0x5 LB: > { %2926 = sst [smem:[#allocation7_spill]] %s2266_s18  ;;  %s33_s26 = sadd.s32 1, %s2282_s22  ;;  %s2294_s25 = sphi %s2381_s25, %s21_s25   ;;  %s2290_s24 = sphi %s2379_s24, %s2944_s24   ;;  %s2286_s23 = sphi %s2377_s23, %s2943_s23   ;;  %s2282_s22 = sphi %s2375_s22, %s2942_s22   ;;  %s2278_s21 = sphi %s2373_s21, %s2941_s21   ;;  %s2274_s20 = sphi %s2371_s20, %s2940_s20   ;;  %s2270_s19 = sphi %s2369_s19, %s2939_s19   ;;  %s2266_s18 = sphi %s2367_s18, %s2938_s18   ;;  %s2262_s17 = sphi %s2365_s17, %s2937_s17  }
   0x6   : > { %2927 = sst [smem:[#allocation8_spill]] %s2282_s22  ;;  %p34_p0 = scmp.ge.s32.totalorder %s33_s26, 3 }
   0x7   : > { %2928 = sst [smem:[#allocation9_spill]] %s2286_s23  ;;  %s36_s27 = sadd.s32 1, %s2286_s23 }
   0x8   : > { %2929 = sst [smem:[#allocation10_spill]] %s2290_s24  ;;  %s1945_s28 = sadd.s32 4294967295, %s2294_s25  }
   0x9   : > { %2930 = sst [smem:[#allocation11_spill]] %s2294_s25  ;;  %s40_s29 = sadd.s32 1, %s2290_s24 }
   0xa   : > { %s2946_s26 = smov (%p34_p0, %s33_s26), 0  ;;  %s2948_s27 = smov (!%p34_p0, %s36_s27), %s2286_s23 }
   0xb   : > { %2931 = sst [smem:[#allocation12_spill]] %s2946_s26  ;;  %s303_s30 = smul.u32 %s2282_s22, %s2286_s23 }
   0xc   : > { %p320_p1 = scmp.ne.s32.totalorder %s2266_s18, %s2262_s17  ;;  %p38_p2 = scmp.ge.s32.totalorder %s2948_s27, 2 }
   0xd   : > { %p321_p3 = scmp.eq.s32.totalorder %s1945_s28, 11  ;;  %p1953_p4 = scmp.ge.s32.totalorder %s2294_s25, 1 }
   0xe   : > { %p408_p5 = scmp.lt.s32.totalorder %s2294_s25, 13  ;;  %s2950_s27 = smov (%p38_p2, %s2948_s27), 0 }
   0xf   : > { %2932 = sst [smem:[#allocation13_spill]] %s2950_s27  ;;  %s2952_s29 = smov (!%p38_p2, %s40_s29), %s2290_s24 }
  0x10   : > { %s304_s12 = smul.u32 %s2950_s27, %s2946_s26  ;;  %p2428_p6 = por %p321_p3, %p320_p1 }
  0x11   : > { %p42_p7 = scmp.ge.s32.totalorder %s2952_s29, 2  ;;  %p409_p8 = pnand %p1953_p4, %p408_p5 }
  0x12   : > { %s306_s14 = ssub.s32 %s303_s30, %s304_s12  ;;  %s310_s28 = sadd.s32 1, %s2266_s18 }
  0x13   : > { %s2954_s29 = smov (%p42_p7, %s2952_s29), 0  ;;  %s460_s27 = sand.u32 (!%p409_p8), 1, %s2262_s17  }
  0x14   : > { %2934 = sst [smem:[#allocation14_spill]] %s2954_s29  ;;  %s305_s15 = ssub.s32 %s2290_s24, %s2954_s29 }
  0x15   : > { %s307_s16 = sor.u32 %s306_s14, %s305_s15  ;;  %412 = sbr.rel (%p409_p8) target bundleno = 1371 (0x55b), region = 64 }
  0x16   : > { %p308_p9 = scmp.eq.s32.totalorder %s307_s16, 0  ;;  %s463_s26 = ssub.s32 (!%p409_p8), 1, %s2274_s20 }
  0x17   : > { %s1954_s30 = sshll.u32 (!%p409_p8), %s460_s27, 6  ;;  %s464_s12 = smul.u32 (!%p409_p8), %s2270_s19, %s463_s26 }
  0x18   : > { %s2438_s23 = scalar_select %p308_p9, %s2266_s18, %s310_s28  }
  0x19   : > { %s1955_s22 = sshll.u32 (!%p409_p8), %s2274_s20, 1  ;;  %p467_p10 = scmp.lt.s32.totalorder (!%p409_p8), %s2278_s21, 1 }
  0x1a   : > { %2935 = sst [smem:[#allocation15_spill]] %s2438_s23  ;;  %s466_s29 = sadd.s32 (!%p409_p8), %s1955_s22, %s464_s12 }
  0x1b   : > { %p469_p11 = scmp.lt.s32.totalorder (!%p409_p8), %s466_s29, 2  ;;  %s1958_s14 = sshll.u32 (!%p409_p8), %s466_s29, 2 }
  0x1c   : > { %s468_s15 = scalar_select %p467_p10, %s2278_s21, 1 }
  0x1d   : > { %s2956_s29 = smov (!%p469_p11, %s466_s29), 2  ;;  %p485_p12 = scmp.lt.s32.totalorder %s1958_s14, 11 }
  0x1e   : > { %s2108_s16 = smul.u32 15, %s468_s15  ;;  %p496_p13 = scmp.eq.s32.totalorder %s2274_s20, 0 }
  0x1f   : > { %s2107_s28 = smul.u32 5, %s2956_s29  ;;  %s2958_s14 = smov (!%p485_p12, %s1958_s14), 11 }
  0x20   : > { %p497_p0 = scmp.eq.s32.totalorder %s2270_s19, 0  ;;  %s487_s26 = scalar_lea.vmem %s2907_s1, %s2958_s14 }
  0x21   : > { %s473_s24 = sadd.s32 %s2108_s16, %s2107_s28  ;;  %s2457_s25 = scalar_lea.vmem [#allocation6], %s1954_s30 }
  0x22   : > { %s1956_s17 = sshll.u32 %s473_s24, 2  ;;  %p498_p1 = pnand %p497_p0, %p496_p13 }
  0x23   : > { %s475_s18 = scalar_lea.vmem %s2906_s0, %s1956_s17  ;;  %v2296_v0 = vmov (!%p498_p1), 0  }
  0x24   : > { %501 = sbr.rel (%p498_p1) target bundleno = 43 (0x2b), region = 68  ;;  %502 = vst [vmem:[%s2457_s25] sm:$0xff] (!%p498_p1), %v2296_v0  ;;  %503 = vst [vmem:[%s2457_s25 + $0x8] sm:$0xff] (!%p498_p1), %v2296_v0 }
  0x25   : > { %504 = vst [vmem:[%s2457_s25 + $0x10] sm:$0xff] (!%p498_p1), %v2296_v0  ;;  %505 = vst [vmem:[%s2457_s25 + $0x18] sm:$0xff] (!%p498_p1), %v2296_v0 }
  0x26   : > { %506 = vst [vmem:[%s2457_s25 + $0x20] sm:$0xff] (!%p498_p1), %v2296_v0  ;;  %507 = vst [vmem:[%s2457_s25 + $0x28] sm:$0xff] (!%p498_p1), %v2296_v0 }
  0x27   : > { %508 = vst [vmem:[%s2457_s25 + $0x30] sm:$0xff] (!%p498_p1), %v2296_v0  ;;  %509 = vst [vmem:[%s2457_s25 + $0x38] sm:$0xff] (!%p498_p1), %v2296_v0 }
  0x2b PF: > { %p1959_p2 = scmp.ne.s32.totalorder %s2274_s20, 0 }
  0x2c   : > { %v514_v1 = vld [vmem:[%s475_s18 + $0x8] sm:$0xff] (!%p1959_p2)  ;;  %v513_v2 = vld [vmem:[%s475_s18] sm:$0xff] (!%p1959_p2)  ;;  %s2297_s23 = smov (!%p1959_p2), 127   ;;  %v2298_v7 = vmov (!%p1959_p2), 0   ;;  %v2197_v8 = vld [vmem:[%s475_s18 + $0x10] ss:$0 sps:$4 sm:$0xff] (!%p1959_p2)  }
  0x2d   : > { %512 = sbr.rel (%p1959_p2) target bundleno = 1210 (0x4ba), region = 72  ;;  %v2468_v3 = vcombine.low (!%p1959_p2), %v514_v1, %v514_v1  ;;  %v2470_v4 = vcombine.low (!%p1959_p2), %v513_v2, %v513_v2  ;;  %v2474_v5 = vcombine.high (!%p1959_p2), %v514_v1, %v514_v1  ;;  %v2476_v6 = vcombine.high (!%p1959_p2), %v513_v2, %v513_v2  ;;  %2192 = vset.pattern.permute.xlu1 (!%p1959_p2), %v2298_v7  ;;  %v2485_v9 = vld [vmem:[%s2908_s2] sm:$0xff] (!%p1959_p2)   ;;  %s2299_s30 = smov (!%p1959_p2), 120   ;;  %v2493_v10 = vld [vmem:[%s2908_s2 + $0x8] sm:$0xff] (!%p1959_p2)   ;;  %v2498_v11 = vld [vmem:[%s2908_s2 + $0x10] sm:$0xff] (!%p1959_p2)  }
  0x2e   : > { %2191 = vset.pattern.permute.xlu0 (!%p1959_p2), %v2298_v7  ;;  %638 = vmatprep.mubr.bf16.mxu0 (!%p1959_p2), %v2298_v7  ;;  %v2505_v12 = vld [vmem:[%s2908_s2 + $0x18] sm:$0xff] (!%p1959_p2)   ;;  %s2300_s22 = smov (!%p1959_p2), 126   ;;  %s2301_s12 = smov (!%p1959_p2), 112   ;;  %v1148_v13 = vld [vmem:[%s2910_s4 + $0x8] sm:$0xff] (!%p1959_p2)  ;;  %v1147_v14 = vld [vmem:[%s2910_s4] sm:$0xff] (!%p1959_p2)  ;;  %vm575_vm0 = vcmask (!%p1959_p2), 1039360  }
  0x2f   : > { %569 = vrot.lane.b32.xlu1 (!%p1959_p2), %v2468_v3, %s2297_s23  ;;  %565 = vrot.lane.b32.xlu0 (!%p1959_p2), %v2470_v4, %s2297_s23  ;;  %v1149_v15 = vld [vmem:[%s2910_s4 + $0x10] sm:$0xff] (!%p1959_p2)  ;;  %v1150_v16 = vld [vmem:[%s2910_s4 + $0x18] sm:$0xff] (!%p1959_p2)  ;;  %vm593_vm1 = vcmask (!%p1959_p2), 1043456   ;;  %vm580_vm2 = vcmask (!%p1959_p2), 64512   ;;  %vm940_vm3 = vcmask (!%p1959_p2), 1031168   ;;  %s2031_s24 = sshll.u32 (!%p1959_p2), %s2270_s19, 7 }
  0x30   : > { %711 = vmatprep.mubr.bf16.mxu1 (!%p1959_p2), %v2298_v7  ;;  %v1215_v17 = vld [vmem:[%s2912_s6] sm:$0xff] (!%p1959_p2)  ;;  %v1216_v18 = vld [vmem:[%s2912_s6 + $0x8] sm:$0xff] (!%p1959_p2)  ;;  %v1217_v19 = vld [vmem:[%s2912_s6 + $0x10] sm:$0xff] (!%p1959_p2)  ;;  %v765_v36 = vsel (!%p1959_p2), %vm593_vm1, %v2470_v4, 0  ;;  %v771_v40 = vsel (!%p1959_p2), %vm593_vm1, %v2468_v3, 0  ;;  %s2654_s15 = scalar_lea.vmem (!%p1959_p2), [#allocation5], %s2031_s24 }
  0x31   : > { %v1218_v20 = vld [vmem:[%s2912_s6 + $0x18] sm:$0xff] (!%p1959_p2)  ;;  %v1381_v21 = vld [vmem:[%s2911_s5] sm:$0xff] (!%p1959_p2)  ;;  %v1382_v22 = vld [vmem:[%s2911_s5 + $0x8] sm:$0xff] (!%p1959_p2)  ;;  %vm1249_vm4 = vcmask (!%p1959_p2), 261120   ;;  %s2689_s28 = scalar_lea.vmem (!%p1959_p2), [#allocation4], %s2031_s24  ;;  %p2008_p3 = scmp.ne.s32.totalorder (!%p1959_p2), %s2270_s19, 0 }
  0x32   : > { %v1383_v23 = vld [vmem:[%s2911_s5 + $0x10] sm:$0xff] (!%p1959_p2)  ;;  %v1384_v24 = vld [vmem:[%s2911_s5 + $0x18] sm:$0xff] (!%p1959_p2) }
  0x33   : > { %571 = vrot.lane.b32.xlu1 (!%p1959_p2), %v2474_v5, %s2297_s23  ;;  %567 = vrot.lane.b32.xlu0 (!%p1959_p2), %v2476_v6, %s2297_s23 }
  0x34   : > { %vm1442_vm5 = vcmask (!%p2008_p3), 7168  }
  0x37   : > { %573 = vrot.lane.b32.xlu0 %v2197_v8, %s2297_s23  ;;  %544 = vrot.lane.b32.xlu1 %v2485_v9, %s2299_s30 }
  0x3b   : > { %546 = vrot.lane.b32.xlu0 %v2493_v10, %s2299_s30  ;;  %548 = vrot.lane.b32.xlu1 %v2498_v11, %s2299_s30 }
  0x3f   : > { %550 = vrot.lane.b32.xlu0 %v2505_v12, %s2299_s30  ;;  %930 = vrot.lane.b32.xlu1 %v2470_v4, %s2300_s22 }
  0x43   : > { %934 = vrot.lane.b32.xlu1 %v2468_v3, %s2300_s22  ;;  %932 = vrot.lane.b32.xlu0 %v2476_v6, %s2300_s22 }
  0x47   : > { %938 = vrot.lane.b32.xlu1 %v2197_v8, %s2300_s22  ;;  %936 = vrot.lane.b32.xlu0 %v2474_v5, %s2300_s22 }
  0x4b   : > { %924 = vrot.lane.b32.xlu1 %v2493_v10, %s2301_s12  ;;  %922 = vrot.lane.b32.xlu0 %v2485_v9, %s2301_s12 }
  0x4f   : > { %1158 = vperm.xlu1 %2192, %v1148_v13   ;;  %1153 = vperm.xlu0 %2191, %v1147_v14  }
  0x53   : > { %1163 = vperm.xlu1 %2192, %v1149_v15   ;;  %1168 = vperm.xlu0 %2191, %v1150_v16  }
  0x57   : > { %926 = vrot.lane.b32.xlu1 %v2498_v11, %s2301_s12  ;;  %928 = vrot.lane.b32.xlu0 %v2505_v12, %s2301_s12 }
  0x5b   : > { %1221 = vperm.xlu1 %2192, %v1215_v17   ;;  %1226 = vperm.xlu0 %2191, %v1216_v18  }
  0x5f   : > { %1231 = vperm.xlu1 %2192, %v1217_v19   ;;  %1236 = vperm.xlu0 %2191, %v1218_v20  }
  0x63   : > { %1387 = vperm.xlu1 %2192, %v1381_v21   ;;  %1392 = vperm.xlu0 %2191, %v1382_v22  }
  0x67   : > { %1397 = vperm.xlu1 %2192, %v1383_v23   ;;  %1402 = vperm.xlu0 %2191, %v1384_v24  }
  0xa1   : > { %v570_v25 = vpop.permute.xlu1 %569  ;;  %v566_v26 = vpop.permute.xlu0 %565 }
  0xa5   : > { %v572_v27 = vpop.permute.xlu1 %571  ;;  %v568_v28 = vpop.permute.xlu0 %567 }
  0xa6   : > { %v577_v29 = vsel %vm575_vm0, %v568_v28, %v570_v25  ;;  %v576_v30 = vsel %vm575_vm0, %v566_v26, %v568_v28  ;;  %v578_v32 = vsel %vm575_vm0, %v570_v25, %v572_v27 }
  0xa7   : > { %1969 = vmatprep.subr.msk.bf16.mxu0 %vm593_vm1, %v577_v29  ;;  %v595_v31 = vsel %vm593_vm1, %v576_v30, 0  ;;  %v601_v37 = vsel %vm593_vm1, %v578_v32, 0 }
  0xa8   : > { %607 = vmatpush1.bf16.msra.mxu0 %v595_v31 }
  0xa9   : > { %v574_v33 = vpop.permute.xlu0 %573  ;;  %v545_v34 = vpop.permute.xlu1 %544  ;;  %1979 = vmatprep.subr.msk.bf16.mxu0 %vm593_vm1, %v2476_v6 }
  0xaa   : > { %v579_v35 = vsel %vm575_vm0, %v572_v27, %v574_v33 }
  0xab   : > { %1970 = vmatmul.mubr.msk.bf16.vlgmr.msra.gmra.mrb[0].mxu0 %vm580_vm2, %v545_v34  ;;  %1974 = vmatprep.subr.msk.bf16.mxu1 %vm593_vm1, %v579_v35 }
  0xac   : > { %680 = vmatpush1.bf16.msra.mxu1 %v601_v37  ;;  %648 = vmatprep.mubr.bf16.mxu0 %v2298_v7 }
  0xad   : > { %v547_v38 = vpop.permute.xlu0 %546  ;;  %v549_v39 = vpop.permute.xlu1 %548  ;;  %1984 = vmatprep.subr.msk.bf16.mxu1 %vm593_vm1, %v2474_v5  ;;  %777 = vmatpush1.bf16.msra.mxu0 %v765_v36 }
  0xaf   : > { %1975 = vmatmul.mubr.msk.bf16.vlgmr.msra.gmra.mrb[0].mxu1 %vm580_vm2, %v545_v34 }
  0xb0   : > { %721 = vmatprep.mubr.bf16.mxu1 %v2298_v7  ;;  %850 = vmatpush1.bf16.msra.mxu1 %v771_v40 }
  0xb1   : > { %v551_v41 = vpop.permute.xlu0 %550  ;;  %v931_v42 = vpop.permute.xlu1 %930 }
  0xb3   : > { %1971 = vmatmul.mubr.msk.bf16.gmra.mrb[4].mxu0 %vm580_vm2, %v547_v38 }
  0xb4   : > { %658 = vmatprep.mubr.bf16.mxu0 %v2298_v7 }
  0xb5   : > { %v935_v43 = vpop.permute.xlu1 %934  ;;  %v933_v44 = vpop.permute.xlu0 %932 }
  0xb6   : > { %v942_v45 = vsel %vm940_vm3, %v933_v44, %v935_v43  ;;  %v941_v49 = vsel %vm940_vm3, %v931_v42, %v933_v44 }
  0xb7   : > { %1976 = vmatmul.mubr.msk.bf16.gmra.mrb[4].mxu1 %vm580_vm2, %v547_v38  ;;  %1989 = vmatprep.subr.msk.bf16.mxu0 %vm593_vm1, %v942_v45  ;;  %v958_v50 = vsel %vm593_vm1, %v941_v49, 0 }
  0xb8   : > { %731 = vmatprep.mubr.bf16.mxu1 %v2298_v7 }
  0xb9   : > { %v939_v46 = vpop.permute.xlu1 %938  ;;  %v937_v47 = vpop.permute.xlu0 %936 }
  0xba   : > { %v944_v48 = vsel %vm940_vm3, %v937_v47, %v939_v46  ;;  %v943_v51 = vsel %vm940_vm3, %v935_v43, %v937_v47 }
  0xbb   : > { %1972 = vmatmul.mubr.msk.bf16.gmra.mrb[8].mxu0 %vm580_vm2, %v549_v39  ;;  %1994 = vmatprep.subr.msk.bf16.mxu1 %vm593_vm1, %v944_v48  ;;  %v964_v52 = vsel %vm593_vm1, %v943_v51, 0 }
  0xbc   : > { %668 = vmatprep.mubr.bf16.mxu0 %v2298_v7 }
  0xbd   : > { %v925_v53 = vpop.permute.xlu1 %924  ;;  %v923_v54 = vpop.permute.xlu0 %922 }
  0xbf   : > { %1977 = vmatmul.mubr.msk.bf16.gmra.mrb[8].mxu1 %vm580_vm2, %v549_v39 }
  0xc0   : > { %741 = vmatprep.mubr.bf16.mxu1 %v2298_v7 }
  0xc3   : > { %1973 = vmatmul.mubr.msk.bf16.gmra.mrb[12].mxu0 %vm580_vm2, %v551_v41 }
  0xc4   : > { %808 = vmatprep.mubr.bf16.mxu0 %v2298_v7 }
  0xc7   : > { %1978 = vmatmul.mubr.msk.bf16.gmra.mrb[12].mxu1 %vm580_vm2, %v551_v41 }
  0xc8   : > { %881 = vmatprep.mubr.bf16.mxu1 %v2298_v7 }
  0xcb   : > { %1980 = vmatmul.mubr.msk.bf16.vlgmr.msra.gmra.mrb[0].mxu0 %vm580_vm2, %v2485_v9 }
  0xcc   : > { %818 = vmatprep.mubr.bf16.mxu0 %v2298_v7  ;;  %970 = vmatpush1.bf16.msra.mxu0 %v958_v50 }
  0xce   : > { %v1159_v55 = vpop.permute.xlu1 %1158  ;;  %v1154_v57 = vpop.permute.xlu0 %1153 }
  0xcf   : > { %1985 = vmatmul.mubr.msk.bf16.vlgmr.msra.gmra.mrb[0].mxu1 %vm580_vm2, %v2485_v9 }
  0xd0   : > { %891 = vmatprep.mubr.bf16.mxu1 %v2298_v7  ;;  %1043 = vmatpush1.bf16.msra.mxu1 %v964_v52 }
  0xd2   : > { %v2616_v56 = vpop.permute.xlu1 %1163  ;;  %v2622_v59 = vpop.permute.xlu0 %1168 }
  0xd3   : > { %1981 = vmatmul.mubr.msk.bf16.gmra.mrb[4].mxu0 %vm580_vm2, %v2493_v10 }
  0xd4   : > { %828 = vmatprep.mubr.bf16.mxu0 %v2298_v7 }
  0xd6   : > { %v927_v58 = vpop.permute.xlu1 %926  ;;  %v929_v60 = vpop.permute.xlu0 %928 }
  0xd7   : > { %1986 = vmatmul.mubr.msk.bf16.gmra.mrb[4].mxu1 %vm580_vm2, %v2493_v10 }
  0xd8   : > { %901 = vmatprep.mubr.bf16.mxu1 %v2298_v7 }
  0xda   : > { %v2632_v4 = vpop.permute.xlu1 %1221 }
  0xdb   : > { %1982 = vmatmul.mubr.msk.bf16.gmra.mrb[8].mxu0 %vm580_vm2, %v2498_v11 }
  0xdc   : > { %838 = vmatprep.mubr.bf16.mxu0 %v2298_v7 }
  0xde   : > { %v2637_v27 = vpop.permute.xlu1 %1231 }
  0xdf   : > { %1987 = vmatmul.mubr.msk.bf16.gmra.mrb[8].mxu1 %vm580_vm2, %v2498_v11 }
  0xe0   : > { %911 = vmatprep.mubr.bf16.mxu1 %v2298_v7 }
  0xe2   : > { %v1388_v50 = vpop.permute.xlu1 %1387 }
  0xe3   : > { %1983 = vmatmul.mubr.msk.bf16.gmra.mrb[12].mxu0 %vm580_vm2, %v2505_v12 }
  0xe4   : > { %1001 = vmatprep.mubr.bf16.mxu0 %v2298_v7 }
  0xe7   : > { %1988 = vmatmul.mubr.msk.bf16.gmra.mrb[12].mxu1 %vm580_vm2, %v2505_v12  ;;  %v2634_v12 = vpop.permute.xlu0 %1226 }
  0xe8   : > { %1074 = vmatprep.mubr.bf16.mxu1 %v2298_v7 }
  0xeb   : > { %1990 = vmatmul.mubr.msk.bf16.vlgmr.msra.gmra.mrb[0].mxu0 %vm580_vm2, %v923_v54  ;;  %v2641_v35 = vpop.permute.xlu0 %1236 }
  0xec   : > { %1011 = vmatprep.mubr.bf16.mxu0 %v2298_v7 }
  0xef   : > { %1995 = vmatmul.mubr.msk.bf16.vlgmr.msra.gmra.mrb[0].mxu1 %vm580_vm2, %v923_v54 }
  0xf0   : > { %1084 = vmatprep.mubr.bf16.mxu1 %v2298_v7 }
  0xf3   : > { %1991 = vmatmul.mubr.msk.bf16.gmra.mrb[4].mxu0 %vm580_vm2, %v925_v53 }
  0xf4   : > { %1021 = vmatprep.mubr.bf16.mxu0 %v2298_v7 }
  0xf7   : > { %1996 = vmatmul.mubr.msk.bf16.gmra.mrb[4].mxu1 %vm580_vm2, %v925_v53 }
  0xf8   : > { %1094 = vmatprep.mubr.bf16.mxu1 %v2298_v7 }
  0xfb   : > { %1992 = vmatmul.mubr.msk.bf16.gmra.mrb[8].mxu0 %vm580_vm2, %v927_v58 }
  0xfc   : > { %1031 = vmatprep.mubr.bf16.mxu0 %v2298_v7 }
  0xff   : > { %1997 = vmatmul.mubr.msk.bf16.gmra.mrb[8].mxu1 %vm580_vm2, %v927_v58 }
 0x100   : > { %1104 = vmatprep.mubr.bf16.mxu1 %v2298_v7 }
 0x103   : > { %1993 = vmatmul.mubr.msk.bf16.gmra.mrb[12].mxu0 %vm580_vm2, %v929_v60 }
 0x104   : > { %1288 = vmatprep.mubr.bf16.mxu0 %v2298_v7 }
 0x107   : > { %1998 = vmatmul.mubr.msk.bf16.gmra.mrb[12].mxu1 %vm580_vm2, %v929_v60  ;;  %v1393_v60 = vpop.permute.xlu0 %1392 }
 0x108   : > { %1341 = vmatprep.mubr.bf16.mxu1 %v2298_v7 }
 0x1be   : > { %v1003_v61 = vpop.f32.mrb[0].mxu0 }
 0x1bf   : > { %v1171_v62 = vadd.f32 %v1154_v57, %v1003_v61  ;;  %v1005_v63 = vpop.f32.mrb[1].mxu0 }
 0x1c0   : > { %v1172_v0 = vadd.f32 %v1154_v57, %v1005_v63  ;;  %v1007_v1 = vpop.f32.mrb[2].mxu0 }
 0x1c1   : > { %v1175_v2 = vadd.f32 %v1159_v55, %v1007_v1  ;;  %v1009_v3 = vpop.f32.mrb[3].mxu0  ;;  %v1187_v8 = vmax.f32 %v1171_v62, 0.0 }
 0x1c2   : > { %v1176_v5 = vadd.f32 %v1159_v55, %v1009_v3  ;;  %v1076_v6 = vpop.f32.mrb[0].mxu1  ;;  %v1188_v13 = vmax.f32 %v1172_v0, 0.0  ;;  %v2202_v0 = vld [vmem:[%s2909_s3] sm:$0xff]  }
 0x1c3   : > { %v1191_v9 = vmax.f32 %v1175_v2, 0.0  ;;  %v1173_v10 = vadd.f32 %v1154_v57, %v1076_v6  ;;  %v1078_v11 = vpop.f32.mrb[1].mxu1 }
 0x1c4   : > { %v1192_v14 = vmax.f32 %v1176_v5, 0.0  ;;  %v1174_v15 = vadd.f32 %v1154_v57, %v1078_v11  ;;  %v1080_v16 = vpop.f32.mrb[2].mxu1 }
 0x1c5   : > { %v1207_v17 = vpack.c.bf16 %v1191_v9, %v1187_v8  ;;  %v1177_v18 = vadd.f32 %v1159_v55, %v1080_v16  ;;  %v1082_v19 = vpop.f32.mrb[3].mxu1  ;;  %v1189_v23 = vmax.f32 %v1173_v10, 0.0 }
 0x1c6   : > { %v1208_v20 = vpack.c.bf16 %v1192_v14, %v1188_v13  ;;  %v1178_v21 = vadd.f32 %v1159_v55, %v1082_v19  ;;  %v1013_v22 = vpop.f32.mrb[4].mxu0  ;;  %v1190_v28 = vmax.f32 %v1174_v15, 0.0  ;;  %v1398_v15 = vpop.permute.xlu1 %1397 }
 0x1c7   : > { %v1193_v24 = vmax.f32 %v1177_v18, 0.0  ;;  %v1179_v25 = vadd.f32 %v2616_v56, %v1013_v22  ;;  %v1015_v26 = vpop.f32.mrb[5].mxu0 }
 0x1c8   : > { %v1194_v29 = vmax.f32 %v1178_v21, 0.0  ;;  %v1180_v30 = vadd.f32 %v2616_v56, %v1015_v26  ;;  %v1017_v31 = vpop.f32.mrb[6].mxu0  ;;  %1256 = vmatprep.subr.bf16.mxu0 %v1208_v20  ;;  %v1403_v20 = vpop.permute.xlu0 %1402 }
 0x1c9   : > { %v1209_v32 = vpack.c.bf16 %v1193_v24, %v1189_v23  ;;  %v1183_v33 = vadd.f32 %v2622_v59, %v1017_v31  ;;  %v1019_v34 = vpop.f32.mrb[7].mxu0  ;;  %1257 = vmatpush1.bf16.msra.mxu0 %v1207_v17  ;;  %v1195_v39 = vmax.f32 %v1179_v25, 0.0  ;;  %v2203_v23 = vld [vmem:[%s2909_s3 + $0x8] sm:$0xff]  }
 0x1ca   : > { %v1210_v36 = vpack.c.bf16 %v1194_v29, %v1190_v28  ;;  %v1184_v37 = vadd.f32 %v2622_v59, %v1019_v34  ;;  %v1086_v38 = vpop.f32.mrb[4].mxu1  ;;  %v1196_v43 = vmax.f32 %v1180_v30, 0.0 }
 0x1cb   : > { %v1199_v40 = vmax.f32 %v1183_v33, 0.0  ;;  %v1181_v41 = vadd.f32 %v2616_v56, %v1086_v38  ;;  %v1088_v42 = vpop.f32.mrb[5].mxu1 }
 0x1cc   : > { %v1200_v44 = vmax.f32 %v1184_v37, 0.0  ;;  %v1182_v45 = vadd.f32 %v2616_v56, %v1088_v42  ;;  %v1090_v46 = vpop.f32.mrb[6].mxu1  ;;  %1309 = vmatprep.subr.bf16.mxu1 %v1210_v36 }
 0x1cd   : > { %v1211_v47 = vpack.c.bf16 %v1199_v40, %v1195_v39  ;;  %v1185_v48 = vadd.f32 %v2622_v59, %v1090_v46  ;;  %v1092_v49 = vpop.f32.mrb[7].mxu1  ;;  %1310 = vmatpush1.bf16.msra.mxu1 %v1209_v32  ;;  %v1197_v54 = vmax.f32 %v1181_v41, 0.0 }
 0x1ce   : > { %v1212_v51 = vpack.c.bf16 %v1200_v44, %v1196_v43  ;;  %v1186_v52 = vadd.f32 %v2622_v59, %v1092_v49  ;;  %v1023_v53 = vpop.f32.mrb[8].mxu0  ;;  %v1198_v61 = vmax.f32 %v1182_v45, 0.0 }
 0x1cf   : > { %v1201_v55 = vmax.f32 %v1185_v48, 0.0  ;;  %v1405_v57 = vadd.f32 %v1388_v50, %v1023_v53  ;;  %v1025_v58 = vpop.f32.mrb[9].mxu0 }
 0x1d0   : > { %v1202_v56 = vmax.f32 %v1186_v52, 0.0  ;;  %v1406_v62 = vadd.f32 %v1388_v50, %v1025_v58  ;;  %v1027_v63 = vpop.f32.mrb[10].mxu0  ;;  %1258 = vmatprep.subr.bf16.mxu0 %v1212_v51 }
 0x1d1   : > { %v1213_v1 = vpack.c.bf16 %v1201_v55, %v1197_v54  ;;  %1423 = vst [vmem:[%s2654_s15] sm:$0xff] %v1405_v57  ;;  %v1409_v59 = vadd.f32 %v1393_v60, %v1027_v63  ;;  %v1029_v2 = vpop.f32.mrb[11].mxu0  ;;  %1259 = vmatpush1.bf16.msra.mxu0 %v1211_v47 }
 0x1d2   : > { %v1214_v3 = vpack.c.bf16 %v1202_v56, %v1198_v61  ;;  %1424 = vst [vmem:[%s2654_s15 + $0x8] sm:$0xff] %v1406_v62  ;;  %v1410_v5 = vadd.f32 %v1393_v60, %v1029_v2  ;;  %v1096_v6 = vpop.f32.mrb[8].mxu1  ;;  %v2302_v2 = vmov (!%p2008_p3), 0.0  }
 0x1d3   : > { %1427 = vst [vmem:[%s2654_s15 + $0x20] sm:$0xff] %v1409_v59  ;;  %v1407_v8 = vadd.f32 %v1388_v50, %v1096_v6  ;;  %v1098_v9 = vpop.f32.mrb[9].mxu1  ;;  %1443 = vst.msk [vmem:[#allocation2] sm:$0xff] (!%p2008_p3), %vm1442_vm5, %v2302_v2 }
 0x1d4   : > { %1428 = vst [vmem:[%s2654_s15 + $0x28] sm:$0xff] %v1410_v5  ;;  %v1408_v10 = vadd.f32 %v1388_v50, %v1098_v9  ;;  %v1100_v11 = vpop.f32.mrb[10].mxu1  ;;  %2001 = vmatmul.mubr.msk.bf16.vlgmr.msra.gmra.mrb[16].mxu0 %vm1249_vm4, %v2202_v0  ;;  %1311 = vmatprep.subr.bf16.mxu1 %v1214_v3  ;;  %1444 = vst.msk [vmem:[#allocation2 + $0x8] sm:$0xff] (!%p2008_p3), %vm1442_vm5, %v2302_v2 }
 0x1d5   : > { %1425 = vst [vmem:[%s2654_s15 + $0x10] sm:$0xff] %v1407_v8  ;;  %v1411_v13 = vadd.f32 %v1393_v60, %v1100_v11  ;;  %v1102_v14 = vpop.f32.mrb[11].mxu1  ;;  %1312 = vmatpush1.bf16.msra.mxu1 %v1213_v1  ;;  %1298 = vmatprep.mubr.bf16.mxu0 %v2298_v7  ;;  %1445 = vst.msk [vmem:[#allocation2 + $0x10] sm:$0xff] (!%p2008_p3), %vm1442_vm5, %v2302_v2 }
 0x1d6   : > { %1426 = vst [vmem:[%s2654_s15 + $0x18] sm:$0xff] %v1408_v10  ;;  %v1412_v16 = vadd.f32 %v1393_v60, %v1102_v14  ;;  %v1033_v17 = vpop.f32.mrb[12].mxu0  ;;  %1446 = vst.msk [vmem:[#allocation2 + $0x18] sm:$0xff] (!%p2008_p3), %vm1442_vm5, %v2302_v2 }
 0x1d7   : > { %1429 = vst [vmem:[%s2654_s15 + $0x30] sm:$0xff] %v1411_v13  ;;  %v1413_v18 = vadd.f32 %v1398_v15, %v1033_v17  ;;  %v1035_v19 = vpop.f32.mrb[13].mxu0 }
 0x1d8   : > { %1430 = vst [vmem:[%s2654_s15 + $0x38] sm:$0xff] %v1412_v16  ;;  %v1414_v21 = vadd.f32 %v1398_v15, %v1035_v19  ;;  %v1037_v22 = vpop.f32.mrb[14].mxu0  ;;  %2003 = vmatmul.mubr.msk.bf16.vlgmr.msra.gmra.mrb[16].mxu1 %vm1249_vm4, %v2202_v0 }
 0x1d9   : > { %1431 = vst [vmem:[%s2654_s15 + $0x40] sm:$0xff] %v1413_v18  ;;  %v1417_v24 = vadd.f32 %v1403_v20, %v1037_v22  ;;  %v1039_v25 = vpop.f32.mrb[15].mxu0  ;;  %1351 = vmatprep.mubr.bf16.mxu1 %v2298_v7 }
 0x1da   : > { %1432 = vst [vmem:[%s2654_s15 + $0x48] sm:$0xff] %v1414_v21  ;;  %v1418_v26 = vadd.f32 %v1403_v20, %v1039_v25  ;;  %v1106_v28 = vpop.f32.mrb[12].mxu1 }
 0x1db   : > { %1435 = vst [vmem:[%s2654_s15 + $0x60] sm:$0xff] %v1417_v24  ;;  %v1415_v29 = vadd.f32 %v1398_v15, %v1106_v28  ;;  %v1108_v30 = vpop.f32.mrb[13].mxu1 }
 0x1dc   : > { %1436 = vst [vmem:[%s2654_s15 + $0x68] sm:$0xff] %v1418_v26  ;;  %v1416_v31 = vadd.f32 %v1398_v15, %v1108_v30  ;;  %v1110_v32 = vpop.f32.mrb[14].mxu1  ;;  %2002 = vmatmul.mubr.msk.bf16.gmra.mrb[20].mxu0 %vm1249_vm4, %v2203_v23 }
 0x1dd   : > { %1433 = vst [vmem:[%s2654_s15 + $0x50] sm:$0xff] %v1415_v29  ;;  %v1419_v33 = vadd.f32 %v1403_v20, %v1110_v32  ;;  %v1112_v34 = vpop.f32.mrb[15].mxu1 }
 0x1de   : > { %1434 = vst [vmem:[%s2654_s15 + $0x58] sm:$0xff] %v1416_v31  ;;  %v1420_v36 = vadd.f32 %v1403_v20, %v1112_v34 }
 0x1df   : > { %1437 = vst [vmem:[%s2654_s15 + $0x70] sm:$0xff] %v1419_v33 }
 0x1e0   : > { %1438 = vst [vmem:[%s2654_s15 + $0x78] sm:$0xff] %v1420_v36  ;;  %2004 = vmatmul.mubr.msk.bf16.gmra.mrb[20].mxu1 %vm1249_vm4, %v2203_v23 }
 0x2a7   : > { %v1290_v7 = vpop.f32.mrb[16].mxu0 }
 0x2a8   : > { %v2682_v37 = vadd.f32 %v1290_v7, %v2632_v4  ;;  %v1292_v38 = vpop.f32.mrb[17].mxu0 }
 0x2a9   : > { %v2685_v39 = vadd.f32 %v1292_v38, %v2632_v4  ;;  %v1294_v40 = vpop.f32.mrb[18].mxu0 }
 0x2aa   : > { %1365 = vst [vmem:[%s2689_s28] sm:$0xff] %v2682_v37  ;;  %v2694_v41 = vadd.f32 %v1294_v40, %v2634_v12  ;;  %v1296_v42 = vpop.f32.mrb[19].mxu0 }
 0x2ab   : > { %1366 = vst [vmem:[%s2689_s28 + $0x8] sm:$0xff] %v2685_v39  ;;  %v2699_v43 = vadd.f32 %v1296_v42, %v2634_v12  ;;  %v1343_v44 = vpop.f32.mrb[16].mxu1 }
 0x2ac   : > { %1369 = vst [vmem:[%s2689_s28 + $0x20] sm:$0xff] %v2694_v41  ;;  %v1344_v45 = vadd.f32 %v1343_v44, %v2632_v4  ;;  %v1345_v46 = vpop.f32.mrb[17].mxu1 }
 0x2ad   : > { %1370 = vst [vmem:[%s2689_s28 + $0x28] sm:$0xff] %v2699_v43  ;;  %v2707_v47 = vadd.f32 %v1345_v46, %v2632_v4  ;;  %v1347_v48 = vpop.f32.mrb[18].mxu1 }
 0x2ae   : > { %1367 = vst [vmem:[%s2689_s28 + $0x10] sm:$0xff] %v1344_v45  ;;  %v2711_v49 = vadd.f32 %v1347_v48, %v2634_v12  ;;  %v1349_v50 = vpop.f32.mrb[19].mxu1 }
 0x2af   : > { %1368 = vst [vmem:[%s2689_s28 + $0x18] sm:$0xff] %v2707_v47  ;;  %v2716_v51 = vadd.f32 %v1349_v50, %v2634_v12  ;;  %v1300_v52 = vpop.f32.mrb[20].mxu0 }
 0x2b0   : > { %1371 = vst [vmem:[%s2689_s28 + $0x30] sm:$0xff] %v2711_v49  ;;  %v1301_v4 = vadd.f32 %v1300_v52, %v2637_v27  ;;  %v1302_v53 = vpop.f32.mrb[21].mxu0 }
 0x2b1   : > { %1372 = vst [vmem:[%s2689_s28 + $0x38] sm:$0xff] %v2716_v51  ;;  %v1303_v54 = vadd.f32 %v1302_v53, %v2637_v27  ;;  %v1304_v55 = vpop.f32.mrb[22].mxu0 }
 0x2b2   : > { %1373 = vst [vmem:[%s2689_s28 + $0x40] sm:$0xff] %v1301_v4  ;;  %v1305_v57 = vadd.f32 %v1304_v55, %v2641_v35  ;;  %v1306_v12 = vpop.f32.mrb[23].mxu0 }
 0x2b3   : > { %1374 = vst [vmem:[%s2689_s28 + $0x48] sm:$0xff] %v1303_v54  ;;  %v1307_v58 = vadd.f32 %v1306_v12, %v2641_v35  ;;  %v1353_v60 = vpop.f32.mrb[20].mxu1  ;;  %1441 = sbr.rel (%p2008_p3) target bundleno = 698 (0x2ba), region = 76 }
 0x2b4   : > { %1377 = vst [vmem:[%s2689_s28 + $0x60] sm:$0xff] %v1305_v57  ;;  %v1354_v61 = vadd.f32 %v1353_v60, %v2637_v27  ;;  %v1355_v56 = vpop.f32.mrb[21].mxu1 }
 0x2b5   : > { %1378 = vst [vmem:[%s2689_s28 + $0x68] sm:$0xff] %v1307_v58  ;;  %v1356_v62 = vadd.f32 %v1355_v56, %v2637_v27  ;;  %v1357_v63 = vpop.f32.mrb[22].mxu1 }
 0x2b6   : > { %1375 = vst [vmem:[%s2689_s28 + $0x50] sm:$0xff] %v1354_v61  ;;  %v1358_v0 = vadd.f32 %v1357_v63, %v2641_v35  ;;  %v1359_v1 = vpop.f32.mrb[23].mxu1 }
 0x2b7   : > { %1376 = vst [vmem:[%s2689_s28 + $0x58] sm:$0xff] %v1356_v62  ;;  %v1360_v59 = vadd.f32 %v1359_v1, %v2641_v35 }
 0x2b8   : > { %1379 = vst [vmem:[%s2689_s28 + $0x70] sm:$0xff] %v1358_v0 }
 0x2b9   : > { %1380 = vst [vmem:[%s2689_s28 + $0x78] sm:$0xff] %v1360_v59 }
 0x2ba PF: > { %v1453_v27 = vlaneseq  ;;  %v1451_v35 = vld [vmem:[%s487_s26] sm:$0xf]  ;;  %vm1513_vm6 = vcmask 7168   ;;  %v1450_v50 = vld [vmem:[#allocation2 + $0x18] sm:$0xff]  ;;  %p2009_p4 = scmp.ne.s32.totalorder %s2270_s19, 2 }
 0x2bb   : > { %v1530_v1 = vld [vmem:[%s2913_s7] sm:$0xff] (!%p2009_p4)  ;;  %v1532_v2 = vld [vmem:[%s2913_s7 + $0x10] sm:$0xff] (!%p2009_p4)  ;;  %vm1558_vm7 = vcmask (!%p2009_p4), 15360  }
 0x2bc   : > { %v2739_v3 = vshrl.u32 %v1453_v27, 7  ;;  %v1531_v27 = vld [vmem:[%s2913_s7 + $0x8] sm:$0xff] (!%p2009_p4) }
 0x2be   : > { %v1455_v5 = vsub.s32 0, %v2739_v3  ;;  %v1459_v6 = vsub.s32 1, %v2739_v3  ;;  %v1463_v8 = vsub.s32 2, %v2739_v3  ;;  %v1467_v9 = vsub.s32 3, %v2739_v3 }
 0x2c0   : > { %v1456_v10 = vrot.slane %v1451_v35, %v1455_v5  ;;  %v1460_v11 = vrot.slane %v1451_v35, %v1459_v6  ;;  %v1464_v13 = vrot.slane %v1451_v35, %v1463_v8  ;;  %v1468_v14 = vrot.slane %v1451_v35, %v1467_v9  ;;  %v1533_v6 = vld [vmem:[%s2913_s7 + $0x18] sm:$0xff] (!%p2009_p4) }
 0x2c2   : > { %v1481_v15 = vmul.f32 %v1456_v10, %v1301_v4  ;;  %v1482_v16 = vmul.f32 %v1460_v11, %v1303_v54  ;;  %v1483_v17 = vmul.f32 %v1464_v13, %v1354_v61  ;;  %v1484_v18 = vmul.f32 %v1468_v14, %v1356_v62 }
 0x2c3   : > { %v1473_v19 = vmul.f32 %v1456_v10, %v2682_v37  ;;  %v1474_v20 = vmul.f32 %v1460_v11, %v2685_v39  ;;  %v1475_v21 = vmul.f32 %v1464_v13, %v1344_v45  ;;  %v1485_v23 = vmul.f32 %v1456_v10, %v1305_v57 }
 0x2c4   : > { %v1499_v22 = vadd.f32 %v1482_v16, %v1481_v15  ;;  %v1486_v24 = vmul.f32 %v1460_v11, %v1307_v58  ;;  %v1487_v25 = vmul.f32 %v1464_v13, %v1358_v0  ;;  %v1476_v26 = vmul.f32 %v1468_v14, %v2707_v47 }
 0x2c5   : > { %v1489_v28 = vadd.f32 %v1474_v20, %v1473_v19  ;;  %v1477_v29 = vmul.f32 %v1456_v10, %v2694_v41  ;;  %v1478_v30 = vmul.f32 %v1460_v11, %v2699_v43  ;;  %v1488_v32 = vmul.f32 %v1468_v14, %v1360_v59  ;;  %v1449_v41 = vld [vmem:[#allocation2 + $0x10] sm:$0xff]  ;;  %v1447_v43 = vld [vmem:[#allocation2] sm:$0xff] }
 0x2c6   : > { %v1500_v31 = vadd.f32 %v1499_v22, %v1483_v17  ;;  %v1504_v33 = vadd.f32 %v1486_v24, %v1485_v23  ;;  %v1479_v34 = vmul.f32 %v1464_v13, %v2711_v49  ;;  %v1480_v7 = vmul.f32 %v1468_v14, %v2716_v51  ;;  %v1448_v51 = vld [vmem:[#allocation2 + $0x8] sm:$0xff] }
 0x2c7   : > { %v1490_v36 = vadd.f32 %v1489_v28, %v1475_v21  ;;  %v1494_v37 = vadd.f32 %v1478_v30, %v1477_v29  ;;  %v2303_v58 = vmov (!%p2009_p4), 0  }
 0x2c8   : > { %v1501_v38 = vadd.f32 %v1500_v31, %v1484_v18  ;;  %v1505_v39 = vadd.f32 %v1504_v33, %v1487_v25  ;;  %2205 = vset.pattern.permute.xlu1 (!%p2009_p4), %v2303_v58  ;;  %2204 = vset.pattern.permute.xlu0 (!%p2009_p4), %v2303_v58  ;;  %v1576_v31 = vld [vmem:[%s2915_s9 + $0x8] sm:$0xff] (!%p2009_p4) }
 0x2c9   : > { %v1491_v40 = vadd.f32 %v1490_v36, %v1476_v26  ;;  %v1495_v42 = vadd.f32 %v1494_v37, %v1479_v34  ;;  %v1572_v26 = vld [vmem:[%s2914_s8] sm:$0x1] (!%p2009_p4)  ;;  %v1577_v34 = vld [vmem:[%s2915_s9 + $0x10] sm:$0xff] (!%p2009_p4) }
 0x2ca   : > { %1502 = vadd.xlane.f32.xlu1 %v1501_v38  ;;  %v1506_v44 = vadd.f32 %v1505_v39, %v1488_v32  ;;  %v1575_v32 = vld [vmem:[%s2915_s9] sm:$0xff] (!%p2009_p4) }
 0x2cb   : > { %1492 = vadd.xlane.f32.xlu0 %v1491_v40  ;;  %v1496_v45 = vadd.f32 %v1495_v42, %v1480_v7  ;;  %v1578_v40 = vld [vmem:[%s2915_s9 + $0x18] sm:$0xff] (!%p2009_p4) }
 0x2ce   : > { %1507 = vadd.xlane.f32.xlu1 %v1506_v44  ;;  %v1600_v44 = vld [vmem:[%s2916_s10 + $0x8] sm:$0xff] (!%p2009_p4) }
 0x2cf   : > { %1497 = vadd.xlane.f32.xlu0 %v1496_v45  ;;  %v1599_v45 = vld [vmem:[%s2916_s10] sm:$0xff] (!%p2009_p4) }
 0x357   : > { %v1503_v46 = vpop.xlane.xlu1 %1502 }
 0x358   : > { %v1511_v47 = vadd.f32 %v1503_v46, %v1449_v41  ;;  %v1493_v48 = vpop.xlane.xlu0 %1492 }
 0x359   : > { %v1509_v49 = vadd.f32 %v1493_v48, %v1447_v43  ;;  %1521 = sbr.rel (%p2009_p4) target bundleno = 1210 (0x4ba), region = 80  ;;  %v1601_v48 = vld [vmem:[%s2916_s10 + $0x10] sm:$0xff] (!%p2009_p4) }
 0x35a   : > { %1516 = vst.msk [vmem:[#allocation2 + $0x10] sm:$0xff] %vm1513_vm6, %v1511_v47 }
 0x35b   : > { %1514 = vst.msk [vmem:[#allocation2] sm:$0xff] %vm1513_vm6, %v1509_v49  ;;  %v1508_v52 = vpop.xlane.xlu1 %1507 }
 0x35c   : > { %v1512_v4 = vadd.f32 %v1508_v52, %v1450_v50  ;;  %v1498_v53 = vpop.xlane.xlu0 %1497 }
 0x35d   : > { %v1510_v54 = vadd.f32 %v1498_v53, %v1448_v51 }
 0x35e   : > { %1517 = vst.msk [vmem:[#allocation2 + $0x18] sm:$0xff] %vm1513_vm6, %v1512_v4  ;;  %v1602_v4 = vld [vmem:[%s2916_s10 + $0x18] sm:$0xff] (!%p2009_p4) }
 0x35f   : > { %1515 = vst.msk [vmem:[#allocation2 + $0x8] sm:$0xff] %vm1513_vm6, %v1510_v54 }
 0x361   : > { %v1524_v55 = vld [vmem:[#allocation2 + $0x10] sm:$0xff] }
 0x362   : > { %v1522_v57 = vld [vmem:[#allocation2] sm:$0xff]  ;;  %v1528_v60 = vmul.f32 0.0008389262, %v1524_v55 }
 0x363   : > { %v1526_v61 = vmul.f32 0.0008389262, %v1522_v57 }
 0x364   : > { %1546 = vperm.xlu1 %2205, %v1528_v60  }
 0x365   : > { %v1525_v12 = vld [vmem:[#allocation2 + $0x18] sm:$0xff]  ;;  %1536 = vperm.xlu0 %2204, %v1526_v61  }
 0x366   : > { %v1523_v56 = vld [vmem:[#allocation2 + $0x8] sm:$0xff]  ;;  %v1529_v62 = vmul.f32 0.0008389262, %v1525_v12 }
 0x367   : > { %v1527_v63 = vmul.f32 0.0008389262, %v1523_v56 }
 0x368   : > { %1551 = vperm.xlu1 %2205, %v1529_v62  }
 0x369   : > { %1541 = vperm.xlu0 %2204, %v1527_v63  }
 0x3e3   : > { %v1547_v0 = vpop.permute.xlu1 %1546 }
 0x3e4   : > { %v1537_v59 = vpop.permute.xlu0 %1536  ;;  %v1556_v10 = vmul.f32 %v1547_v0, %v1532_v2 }
 0x3e5   : > { %v1554_v35 = vmul.f32 %v1537_v59, %v1530_v1 }
 0x3e6   : > { %v1562_v17 = vsel %vm1558_vm7, %v1556_v10, 0.0 }
 0x3e7   : > { %v1552_v8 = vpop.permute.xlu1 %1551  ;;  %v1559_v13 = vsel %vm1558_vm7, %v1554_v35, 0.0 }
 0x3e8   : > { %v1542_v9 = vpop.permute.xlu0 %1541  ;;  %v1557_v14 = vmul.f32 %v1552_v8, %v1533_v6 }
 0x3e9   : > { %v1555_v11 = vmul.f32 %v1542_v9, %v1531_v27 }
 0x3ea   : > { %v1564_v19 = vsel %vm1558_vm7, %v1557_v14, 0.0 }
 0x3eb   : > { %v1560_v15 = vsel %vm1558_vm7, %v1555_v11, 0.0 }
 0x3ec   : > { %v1561_v16 = vadd.f32 %v1560_v15, %v1559_v13 }
 0x3ee   : > { %v1563_v18 = vadd.f32 %v1562_v17, %v1561_v16 }
 0x3f0   : > { %v1565_v20 = vadd.f32 %v1564_v19, %v1563_v18 }
 0x3f2   : > { %v1566_v21 = vrot.slane %v1565_v20, 4 }
 0x3f4   : > { %v1567_v22 = vadd.f32 %v1566_v21, %v1565_v20 }
 0x3f6   : > { %v1568_v23 = vrot.slane %v1567_v22, 2 }
 0x3f8   : > { %v1569_v24 = vadd.f32 %v1568_v23, %v1567_v22 }
 0x3fa   : > { %v1570_v25 = vrot.slane %v1569_v24, 1 }
 0x3fc   : > { %v1571_v28 = vadd.f32 %v1570_v25, %v1569_v24 }
 0x3fe   : > { %v1573_v29 = vadd.f32 %v1572_v26, %v1571_v28 }
 0x400   : > { %v1574_v30 = vmax.f32 %v1573_v29, 0.0 }
 0x402   : > { %v1582_v33 = vrot.slane %v1574_v30, %v1455_v5 }
 0x404   : > { %v1584_v36 = vmul.f32 %v1582_v33, %v1576_v31  ;;  %v1583_v7 = vmul.f32 %v1582_v33, %v1575_v32  ;;  %v1585_v39 = vmul.f32 %v1582_v33, %v1577_v34  ;;  %v1586_v5 = vmul.f32 %v1582_v33, %v1578_v40 }
 0x406   : > { %v1590_v37 = vsel %vm1558_vm7, %v1584_v36, 0.0  ;;  %v1587_v38 = vsel %vm1558_vm7, %v1583_v7, 0.0  ;;  %v1593_v3 = vsel %vm1558_vm7, %v1585_v39, 0.0  ;;  %v1596_v42 = vsel %vm1558_vm7, %v1586_v5, 0.0 }
 0x407   : > { %1591 = vadd.xlane.f32.xlu1 %v1590_v37  ;;  %1588 = vadd.xlane.f32.xlu0 %v1587_v38 }
 0x40b   : > { %1594 = vadd.xlane.f32.xlu0 %v1593_v3 }
 0x40f   : > { %1597 = vadd.xlane.f32.xlu0 %v1596_v42 }
 0x494   : > { %v1592_v41 = vpop.xlane.xlu1 %1591  ;;  %v1589_v43 = vpop.xlane.xlu0 %1588 }
 0x495   : > { %v1604_v46 = vadd.f32 %v1600_v44, %v1592_v41  ;;  %v1603_v47 = vadd.f32 %v1599_v45, %v1589_v43 }
 0x497   : > { %v2011_v49 = vmul.f32 -1.442695, %v1604_v46  ;;  %v2010_v50 = vmul.f32 -1.442695, %v1603_v47 }
 0x498   : > { %v1595_v51 = vpop.xlane.xlu0 %1594 }
 0x499   : > { %2206 = vpow2.f32 %v2011_v49  ;;  %v1605_v52 = vadd.f32 %v1601_v48, %v1595_v51 }
 0x49a   : > { %2208 = vpow2.f32 %v2010_v50 }
 0x49b   : > { %v2012_v53 = vmul.f32 -1.442695, %v1605_v52 }
 0x49c   : > { %v1598_v54 = vpop.xlane.xlu0 %1597 }
 0x49d   : > { %2210 = vpow2.f32 %v2012_v53  ;;  %v1606_v55 = vadd.f32 %v1602_v4, %v1598_v54 }
 0x49f   : > { %v2013_v57 = vmul.f32 -1.442695, %v1606_v55 }
 0x4a1   : > { %2212 = vpow2.f32 %v2013_v57 }
 0x4a3   : > { %v2207_v12 = vpop.eup %2206 }
 0x4a4   : > { %v2209_v58 = vpop.eup %2208  ;;  %v1620_v60 = vadd.f32 1.0, %v2207_v12 }
 0x4a5   : > { %v1619_v61 = vadd.f32 1.0, %v2209_v58 }
 0x4a6   : > { %2214 = vrcp.f32 %v1620_v60 }
 0x4a7   : > { %v2211_v56 = vpop.eup %2210  ;;  %2216 = vrcp.f32 %v1619_v61 }
 0x4a8   : > { %v1621_v62 = vadd.f32 1.0, %v2211_v56 }
 0x4aa   : > { %2218 = vrcp.f32 %v1621_v62 }
 0x4ab   : > { %v2213_v63 = vpop.eup %2212 }
 0x4ac   : > { %v1622_v0 = vadd.f32 1.0, %v2213_v63 }
 0x4ae   : > { %2220 = vrcp.f32 %v1622_v0 }
 0x4b0   : > { %v2215_v1 = vpop.eup %2214 }
 0x4b1   : > { %v2217_v59 = vpop.eup %2216  ;;  %1632 = vst.msk [vmem:[#allocation3 + $0x8] sm:$0xff] %vm1513_vm6, %v2215_v1 }
 0x4b2   : > { %1631 = vst.msk [vmem:[#allocation3] sm:$0xff] %vm1513_vm6, %v2217_v59 }
 0x4b4   : > { %v2219_v2 = vpop.eup %2218 }
 0x4b5   : > { %1633 = vst.msk [vmem:[#allocation3 + $0x10] sm:$0xff] %vm1513_vm6, %v2219_v2 }
 0x4b8   : > { %v2221_v27 = vpop.eup %2220 }
 0x4b9   : > { %1634 = vst.msk [vmem:[#allocation3 + $0x18] sm:$0xff] %vm1513_vm6, %v2221_v27 }
 0x4ba PF: > { %p2014_p5 = scmp.ne.s32.totalorder %s2274_s20, 1 }
 0x4bb   : > { %v1658_v6 = vld [vmem:[#allocation3] sm:$0xff] (!%p2014_p5)  ;;  %v2304_v8 = vmov (!%p2014_p5), 0   ;;  %v1659_v10 = vld [vmem:[#allocation3 + $0x8] sm:$0xff] (!%p2014_p5)  ;;  %s2033_s18 = sshll.u32 (!%p2014_p5), %s2270_s19, 7 }
 0x4bc   : > { %1638 = sbr.rel (%p2014_p5) target bundleno = 1360 (0x550), region = 84  ;;  %v1660_v35 = vld [vmem:[#allocation3 + $0x10] sm:$0xff] (!%p2014_p5)  ;;  %2223 = vset.pattern.permute.xlu1 (!%p2014_p5), %v2304_v8  ;;  %2222 = vset.pattern.permute.xlu0 (!%p2014_p5), %v2304_v8  ;;  %s2819_s17 = scalar_lea.vmem (!%p2014_p5), [#allocation4], %s2033_s18 }
 0x4bd   : > { %1674 = vperm.xlu1 (!%p2014_p5), %2223, %v1660_v35   ;;  %1664 = vperm.xlu0 (!%p2014_p5), %2222, %v1658_v6   ;;  %v1650_v11 = vld [vmem:[%s2819_s17 + $0x40] sm:$0xff] (!%p2014_p5)  ;;  %v1651_v13 = vld [vmem:[%s2819_s17 + $0x48] sm:$0xff] (!%p2014_p5)  ;;  %v1652_v14 = vld [vmem:[%s2819_s17 + $0x50] sm:$0xff] (!%p2014_p5)  ;;  %s2825_s14 = scalar_lea.vmem (!%p2014_p5), [#allocation5], %s2033_s18 }
 0x4be   : > { %v1653_v15 = vld [vmem:[%s2819_s17 + $0x58] sm:$0xff] (!%p2014_p5)  ;;  %v1708_v16 = vld [vmem:[%s2825_s14 + $0x40] sm:$0xff] (!%p2014_p5)  ;;  %v1709_v17 = vld [vmem:[%s2825_s14 + $0x48] sm:$0xff] (!%p2014_p5) }
 0x4bf   : > { %v1642_v18 = vld [vmem:[%s2819_s17] sm:$0xff] (!%p2014_p5)  ;;  %v1643_v19 = vld [vmem:[%s2819_s17 + $0x8] sm:$0xff] (!%p2014_p5)  ;;  %v1644_v20 = vld [vmem:[%s2819_s17 + $0x10] sm:$0xff] (!%p2014_p5) }
 0x4c0   : > { %v1661_v9 = vld [vmem:[#allocation3 + $0x18] sm:$0xff] (!%p2014_p5)  ;;  %v1710_v23 = vld [vmem:[%s2825_s14 + $0x50] sm:$0xff] (!%p2014_p5)  ;;  %v1700_v26 = vld [vmem:[%s2825_s14] sm:$0xff] (!%p2014_p5) }
 0x4c1   : > { %1679 = vperm.xlu1 (!%p2014_p5), %2223, %v1661_v9   ;;  %1669 = vperm.xlu0 (!%p2014_p5), %2222, %v1659_v10   ;;  %v1645_v21 = vld [vmem:[%s2819_s17 + $0x18] sm:$0xff] (!%p2014_p5)  ;;  %v1701_v32 = vld [vmem:[%s2825_s14 + $0x8] sm:$0xff] (!%p2014_p5)  ;;  %v1702_v33 = vld [vmem:[%s2825_s14 + $0x10] sm:$0xff] (!%p2014_p5) }
 0x4c2   : > { %v1711_v24 = vld [vmem:[%s2825_s14 + $0x58] sm:$0xff] (!%p2014_p5)  ;;  %v1654_v42 = vld [vmem:[%s2819_s17 + $0x60] sm:$0xff] (!%p2014_p5)  ;;  %v1655_v44 = vld [vmem:[%s2819_s17 + $0x68] sm:$0xff] (!%p2014_p5) }
 0x4c3   : > { %v1703_v34 = vld [vmem:[%s2825_s14 + $0x18] sm:$0xff]  ;;  %v1656_v48 = vld [vmem:[%s2819_s17 + $0x70] sm:$0xff]  ;;  %v1646_v50 = vld [vmem:[%s2819_s17 + $0x20] sm:$0xff] }
 0x4c4   : > { %v1657_v49 = vld [vmem:[%s2819_s17 + $0x78] sm:$0xff]  ;;  %v1647_v54 = vld [vmem:[%s2819_s17 + $0x28] sm:$0xff]  ;;  %v1648_v55 = vld [vmem:[%s2819_s17 + $0x30] sm:$0xff] }
 0x4c5   : > { %v1712_v61 = vld [vmem:[%s2825_s14 + $0x60] sm:$0xff]  ;;  %v1713_v56 = vld [vmem:[%s2825_s14 + $0x68] sm:$0xff]  ;;  %v1714_v2 = vld [vmem:[%s2825_s14 + $0x70] sm:$0xff] }
 0x4c6   : > { %v1715_v27 = vld [vmem:[%s2825_s14 + $0x78] sm:$0xff] }
 0x4c7   : > { %v1649_v35 = vld [vmem:[%s2819_s17 + $0x38] sm:$0xff] }
 0x53c   : > { %v1675_v22 = vpop.permute.xlu1 %1674  ;;  %v1665_v25 = vpop.permute.xlu0 %1664 }
 0x53d   : > { %v1690_v28 = vmul.f32 %v1675_v22, %v1650_v11  ;;  %v1691_v29 = vmul.f32 %v1675_v22, %v1651_v13  ;;  %v1692_v30 = vmul.f32 %v1675_v22, %v1652_v14  ;;  %v1693_v31 = vmul.f32 %v1675_v22, %v1653_v15  ;;  %v1704_v11 = vld [vmem:[%s2825_s14 + $0x20] sm:$0xff]  ;;  %v1705_v13 = vld [vmem:[%s2825_s14 + $0x28] sm:$0xff] }
 0x53e   : > { %v1682_v36 = vmul.f32 %v1665_v25, %v1642_v18  ;;  %v1683_v7 = vmul.f32 %v1665_v25, %v1643_v19  ;;  %v1684_v37 = vmul.f32 %v1665_v25, %v1644_v20  ;;  %v1685_v38 = vmul.f32 %v1665_v25, %v1645_v21  ;;  %v1706_v18 = vld [vmem:[%s2825_s14 + $0x30] sm:$0xff]  ;;  %v1707_v19 = vld [vmem:[%s2825_s14 + $0x38] sm:$0xff] }
 0x53f   : > { %v1724_v39 = vadd.f32 %v1708_v16, %v1690_v28  ;;  %v1725_v40 = vadd.f32 %v1709_v17, %v1691_v29  ;;  %v1726_v3 = vadd.f32 %v1710_v23, %v1692_v30  ;;  %v1727_v5 = vadd.f32 %v1711_v24, %v1693_v31 }
 0x540   : > { %v1716_v45 = vadd.f32 %v1700_v26, %v1682_v36  ;;  %v1717_v41 = vadd.f32 %v1701_v32, %v1683_v7  ;;  %v1718_v43 = vadd.f32 %v1702_v33, %v1684_v37  ;;  %v1719_v46 = vadd.f32 %v1703_v34, %v1685_v38  ;;  %v1680_v47 = vpop.permute.xlu1 %1679  ;;  %v1670_v62 = vpop.permute.xlu0 %1669 }
 0x541   : > { %v1740_v51 = vmax.f32 %v1724_v39, 0.0  ;;  %v1741_v52 = vmax.f32 %v1725_v40, 0.0  ;;  %v1742_v4 = vmax.f32 %v1726_v3, 0.0  ;;  %v1743_v53 = vmax.f32 %v1727_v5, 0.0 }
 0x542   : > { %v1732_v57 = vmax.f32 %v1716_v45, 0.0  ;;  %v1733_v12 = vmax.f32 %v1717_v41, 0.0  ;;  %v1734_v58 = vmax.f32 %v1718_v43, 0.0  ;;  %v1735_v60 = vmax.f32 %v1719_v46, 0.0 }
 0x543   : > { %v2039_v63 = vpack.c.bf16 %v1741_v52, %v1740_v51  ;;  %v2040_v0 = vpack.c.bf16 %v1743_v53, %v1742_v4  ;;  %v1694_v1 = vmul.f32 %v1680_v47, %v1654_v42  ;;  %v1695_v59 = vmul.f32 %v1680_v47, %v1655_v44 }
 0x544   : > { %v2035_v6 = vpack.c.bf16 %v1733_v12, %v1732_v57  ;;  %v2036_v8 = vpack.c.bf16 %v1735_v60, %v1734_v58  ;;  %v1696_v9 = vmul.f32 %v1680_v47, %v1656_v48  ;;  %v1697_v10 = vmul.f32 %v1680_v47, %v1657_v49 }
 0x545   : > { %1800 = vst [vmem:[%s2457_s25 + $0x20] sm:$0xff] %v2039_v63  ;;  %1801 = vst [vmem:[%s2457_s25 + $0x28] sm:$0xff] %v2040_v0  ;;  %v1728_v14 = vadd.f32 %v1712_v61, %v1694_v1  ;;  %v1729_v15 = vadd.f32 %v1713_v56, %v1695_v59  ;;  %v1686_v16 = vmul.f32 %v1670_v62, %v1646_v50 }
 0x546   : > { %v1687_v17 = vmul.f32 %v1670_v62, %v1647_v54  ;;  %1796 = vst [vmem:[%s2457_s25] sm:$0xff] %v2035_v6  ;;  %1797 = vst [vmem:[%s2457_s25 + $0x8] sm:$0xff] %v2036_v8  ;;  %v1730_v20 = vadd.f32 %v1714_v2, %v1696_v9  ;;  %v1731_v21 = vadd.f32 %v1715_v27, %v1697_v10 }
 0x547   : > { %v1688_v22 = vmul.f32 %v1670_v62, %v1648_v55  ;;  %v1689_v23 = vmul.f32 %v1670_v62, %v1649_v35  ;;  %v1744_v24 = vmax.f32 %v1728_v14, 0.0  ;;  %v1745_v25 = vmax.f32 %v1729_v15, 0.0 }
 0x548   : > { %v1720_v26 = vadd.f32 %v1704_v11, %v1686_v16  ;;  %v1721_v28 = vadd.f32 %v1705_v13, %v1687_v17  ;;  %v1746_v29 = vmax.f32 %v1730_v20, 0.0  ;;  %v1747_v30 = vmax.f32 %v1731_v21, 0.0 }
 0x549   : > { %v1722_v31 = vadd.f32 %v1706_v18, %v1688_v22  ;;  %v1723_v32 = vadd.f32 %v1707_v19, %v1689_v23  ;;  %v2041_v33 = vpack.c.bf16 %v1745_v25, %v1744_v24 }
 0x54a   : > { %v1736_v34 = vmax.f32 %v1720_v26, 0.0  ;;  %v1737_v36 = vmax.f32 %v1721_v28, 0.0  ;;  %v2042_v7 = vpack.c.bf16 %v1747_v30, %v1746_v29 }
 0x54b   : > { %v1738_v37 = vmax.f32 %v1722_v31, 0.0  ;;  %v1739_v38 = vmax.f32 %v1723_v32, 0.0  ;;  %1802 = vst [vmem:[%s2457_s25 + $0x30] sm:$0xff] %v2041_v33 }
 0x54c   : > { %v2037_v39 = vpack.c.bf16 %v1737_v36, %v1736_v34  ;;  %1803 = vst [vmem:[%s2457_s25 + $0x38] sm:$0xff] %v2042_v7 }
 0x54d   : > { %v2038_v40 = vpack.c.bf16 %v1739_v38, %v1738_v37 }
 0x54e   : > { %1798 = vst [vmem:[%s2457_s25 + $0x10] sm:$0xff] %v2037_v39 }
 0x54f   : > { %1799 = vst [vmem:[%s2457_s25 + $0x18] sm:$0xff] %v2038_v40 }
 0x550 PF: > { %1810 = sbr.rel (!%p2428_p6) target bundleno = 1371 (0x55b), region = 88  ;;  %v1829_v3 = vld [vmem:[%s2457_s25] sm:$0xff] (%p2428_p6)  ;;  %v1831_v5 = vld [vmem:[%s2457_s25 + $0x8] sm:$0xff] (%p2428_p6) }
 0x551   : > { %s1811_s26 = smul.u32 (%p2428_p6), %s2270_s19, %s2274_s20  ;;  %v1837_v45 = vld [vmem:[%s2457_s25 + $0x20] sm:$0xff] (%p2428_p6)  ;;  %v1839_v41 = vld [vmem:[%s2457_s25 + $0x28] sm:$0xff] (%p2428_p6) }
 0x552   : > { %s2109_s27 = smul.u32 (%p2428_p6), 48, %s2278_s21  ;;  %v1841_v43 = vld [vmem:[%s2457_s25 + $0x30] sm:$0xff] (%p2428_p6) }
 0x553   : > { %s2027_s22 = sshll.u32 (%p2428_p6), %s1811_s26, 2  ;;  %v1843_v46 = vld [vmem:[%s2457_s25 + $0x38] sm:$0xff] (%p2428_p6) }
 0x554   : > { %s1814_s13 = sadd.s32 (%p2428_p6), %s2109_s27, %s2027_s22 }
 0x555   : > { %v1833_v42 = vld [vmem:[%s2457_s25 + $0x10] sm:$0xff] (%p2428_p6)  ;;  %s2028_s23 = sshll.u32 (%p2428_p6), %s1814_s13, 2 }
 0x556   : > { %v1835_v44 = vld [vmem:[%s2457_s25 + $0x18] sm:$0xff] (%p2428_p6)  ;;  %s1816_s30 = scalar_lea.vmem (%p2428_p6), %s2917_s11, %s2028_s23 }
 0x557   : > { %1830 = vst [vmem:[%s1816_s30] sm:$0xff] %v1829_v3  ;;  %1832 = vst [vmem:[%s1816_s30 + $0x8] sm:$0xff] %v1831_v5 }
 0x558   : > { %1834 = vst [vmem:[%s1816_s30 + $0x30] sm:$0xff] %v1833_v42  ;;  %1836 = vst [vmem:[%s1816_s30 + $0x38] sm:$0xff] %v1835_v44 }
 0x559   : > { %1838 = vst [vmem:[%s1816_s30 + $0x60] sm:$0xff] %v1837_v45  ;;  %1840 = vst [vmem:[%s1816_s30 + $0x68] sm:$0xff] %v1839_v41 }
 0x55a   : > { %1842 = vst [vmem:[%s1816_s30 + $0x90] sm:$0xff] %v1841_v43  ;;  %1844 = vst [vmem:[%s1816_s30 + $0x98] sm:$0xff] %v1843_v46 }
 0x55b PF: > { %s2936_s19 = sld [smem:[#allocation11_spill]]  ;;  %s2937_s17 = sld [smem:[#allocation7_spill]] }
 0x55c   : > { %s2938_s18 = sld [smem:[#allocation15_spill]]  ;;  %s2940_s20 = sld [smem:[#allocation9_spill]] }
 0x55d   : > { %s2941_s21 = sld [smem:[#allocation10_spill]]  ;;  %s2942_s22 = sld [smem:[#allocation12_spill]] }
 0x55e   : > { %s2943_s23 = sld [smem:[#allocation13_spill]]  ;;  %s2944_s24 = sld [smem:[#allocation14_spill]] }
 0x561   : > { %s21_s25 = sadd.s32 1, %s2936_s19   ;;  %s2939_s19 = sld [smem:[#allocation8_spill]] }
 0x562   : > { %p18_p6 = scmp.ge.s32.totalorder %s21_s25, 14  }
 0x564   :  { %20 = sbr.rel (!%p18_p6) target bundleno = 5 (0x5), region = 144 }

</bundles_post_ra>
